<compile_context>
chip_gen: v7x
topology: tpu7x:2x2x1
jax: 0.10.0
libtpu: 0.0.40
codegen_flags: <defaults>
</compile_context>

<pallas_src>
import functools

import jax
import jax.numpy as jnp
import numpy as np
from jax import lax
from jax.experimental import pallas as pl
from jax.experimental.pallas import tpu as pltpu


def _round_up(v, m):
    return (v + m - 1) // m * m


# HIGHEST keeps the 1e-3 check safe; for large C on v5e this can be dropped to DEFAULT
# after re-validating the tolerance (on v6e/v7x the extra MXU passes are hidden anyway).
_PREC = lax.Precision.HIGHEST


# --------------------------------------------------------------------------- #
# Fused kernel: ChannelGate + SpatialGate + combine, one batch item per step   #
# --------------------------------------------------------------------------- #
def cbam_fused_kernel(x_ref, wcat_ref, w2_ref, wd_ref, bcol_ref, mask_ref, o_ref, *,
                      C, Cr, Crp, H, W, HW, HWp, d):
    f32 = jnp.float32
    x2 = x_ref[0].astype(f32)                                   # (C, HWp), lane-dense

    # Packed per-channel constant columns (see host packing).
    bc = bcol_ref[...]
    br, b1 = bc[0:Crp, 0:1], bc[0:Crp, 1:2]
    bd = (bc[0:Crp, 2:3], bc[0:Crp, 3:4])
    wfv = bc[0:Crp, 4:5]
    b2 = bc[0:C, 5:6]
    bf = bc[0:1, 6:7]

    # ---- one stacked MXU matmul against x -------------------------------------
    #   rows [0:Crp)     : SpatialGate 1x1 reduce conv (BN folded; padded rows zero)
    #   rows [Crp:2*Crp) : ChannelGate Linear(C, Cr) applied per-pixel; taking the
    #                      spatial mean afterwards equals W1 @ GAP(x) (mean commutes).
    rw = jnp.dot(wcat_ref[...], x2, precision=_PREC,
                 preferred_element_type=f32)                    # (2*Crp, HWp)

    # ChannelGate hidden: GAP -> Linear -> ReLU (second Linear fused further below).
    # Divide by the *real* pixel count; padded spatial columns of x are zero.
    h = jnp.maximum(jnp.sum(rw[Crp:2 * Crp, :], axis=1, keepdims=True) * (1.0 / HW)
                    + b1, 0.0)                                  # (Crp, 1)

    # SpatialGate: 1x1 reduce conv + folded BN + ReLU (flat, lane-dense).
    act = jnp.maximum(rw[0:Crp, :] + br, 0.0)                   # (Crp, HWp)

    # ---- two dilated 3x3 convs (dilation = padding = d), flat-domain ------------
    # Each tap = lane roll of the flat map by (dh*W + dw) + host-precomputed validity
    # mask (replaces the old zero-padded 2-D scratch and per-row copy loops).  The 9
    # masked taps are stacked along K so each layer is one (Crp, 9*Crp) MXU matmul.
    offs = [((kh - 1) * d, (kw - 1) * d) for kh in range(3) for kw in range(3)]
    tm = mask_ref[...]                                          # (9, HWp), 0/1 f32
    for layer in range(2):
        taps = []
        for t, (dh, dw) in enumerate(offs):
            s = dh * W + dw
            if s == 0:
                taps.append(act)                                # center tap: identity
            else:
                shifted = pltpu.roll(act, shift=(-s) % HWp, axis=1)
                taps.append(shifted * tm[t:t + 1, :])
        stack = jnp.concatenate(taps, axis=0)                   # (9*Crp, HWp)
        act = jnp.maximum(jnp.dot(wd_ref[layer], stack, precision=_PREC,
                                  preferred_element_type=f32) + bd[layer], 0.0)

    # Final 1x1 conv (Cr -> 1): tiny K, so a sublane reduction instead of an MXU dot.
    s_gate = jnp.sum(act * wfv, axis=0, keepdims=True) + bf     # (1, HWp)

    # ---- att = 1 + sigmoid(channel_gate * spatial_gate);  out = att * x ---------
    # (W2 @ h + b2) * s == W2 @ (h * s) + b2 * s   (exact reassociation; keeps the
    # work lane-dense over HW instead of a degenerate N=1 contraction).
    hs = h * s_gate                                             # (Crp, HWp)
    g = b2 * s_gate
    if Cr <= 8:
        # Tiny hidden width: a K=Cr MXU dot wastes the systolic array; a couple of
        # lane-dense VPU FMAs are free filler under the HBM-bound regime.
        w2 = w2_ref[...]
        for k in range(Cr):
            g = g + w2[:, k:k + 1] * hs[k:k + 1, :]
    else:
        g = g + jnp.dot(w2_ref[...], hs, precision=_PREC, preferred_element_type=f32)
    att = 1.5 + 0.5 * jnp.tanh(0.5 * g)                         # == 1 + sigmoid(g)
    o_ref[0] = (att * x2).astype(o_ref.dtype)


# --------------------------------------------------------------------------- #
# Host-side wrapper                                                            #
# --------------------------------------------------------------------------- #
def _fold_bn(w, b, gamma, beta, mean, var, eps=1e-5):
    s = gamma / jnp.sqrt(var + eps)
    w_eff = w * s.reshape((-1,) + (1,) * (w.ndim - 1))
    b_eff = b * s + (beta - mean * s)
    return w_eff, b_eff


def cbam_forward(x, params, dilation=4):
    B, C, H, W = x.shape
    Cr = params['wr'].shape[0]
    d = dilation
    HW = H * W
    HWp = _round_up(HW, 128)            # lane-dense flat spatial dim (unmasked vst)
    Crp = _round_up(max(Cr, 8), 8)      # sublane-aligned hidden width
    f32 = jnp.float32
    out_dtype = x.dtype

    # Fold inference-mode BN into the conv weights/biases (numerically equivalent).
    wr_eff, br_eff = _fold_bn(params['wr'][:, :, 0, 0].astype(f32), params['br'].astype(f32),
                              params['g0'], params['be0'], params['m0'], params['v0'])
    wd0_eff, bd0_eff = _fold_bn(params['wd0'].astype(f32), params['bd0'].astype(f32),
                                params['gd0'], params['bed0'], params['md0'], params['vd0'])
    wd1_eff, bd1_eff = _fold_bn(params['wd1'].astype(f32), params['bd1'].astype(f32),
                                params['gd1'], params['bed1'], params['md1'], params['vd1'])

    # x / out stay in the caller's dtype; flat spatial dim zero-padded to a 128 multiple.
    x2 = x.reshape(B, C, HW)
    if HWp != HW:
        x2 = jnp.pad(x2, ((0, 0), (0, 0), (0, HWp - HW)))

    # Stacked-matmul weights, sublane-aligned split: reduce-conv rows at [0:Cr),
    # ChannelGate W1 rows at [Crp:Crp+Cr); padded rows are zero.
    wcat = jnp.zeros((2 * Crp, C), f32)
    wcat = wcat.at[0:Cr, :].set(wr_eff)
    wcat = wcat.at[Crp:Crp + Cr, :].set(params['w1'].astype(f32))

    # ChannelGate second Linear, zero-padded hidden columns.
    w2p = jnp.zeros((C, Crp), f32).at[:, 0:Cr].set(params['w2'].astype(f32))

    # Dilated 3x3 conv weights, tap-stacked along K: layer l is (Crp, 9*Crp), with tap
    # t = kh*3 + kw occupying columns [t*Crp : t*Crp+Cr)  (no (.,1,1) scalar tiles).
    def pack_wd(w_eff):
        wl = jnp.zeros((Crp, 9 * Crp), f32)
        for kh in range(3):
            for kw in range(3):
                t = kh * 3 + kw
                wl = wl.at[0:Cr, t * Crp:t * Crp + Cr].set(w_eff[:, :, kh, kw])
        return wl
    wd = jnp.stack([pack_wd(wd0_eff), pack_wd(wd1_eff)])        # (2, Crp, 9*Crp)

    # All per-channel bias-like vectors packed into one column slab.
    R = max(C, Crp)
    bcol = jnp.zeros((R, 8), f32)
    bcol = bcol.at[0:Cr, 0].set(br_eff.astype(f32))
    bcol = bcol.at[0:Cr, 1].set(params['b1'].astype(f32))
    bcol = bcol.at[0:Cr, 2].set(bd0_eff.astype(f32))
    bcol = bcol.at[0:Cr, 3].set(bd1_eff.astype(f32))
    bcol = bcol.at[0:Cr, 4].set(params['wf'][0, :, 0, 0].astype(f32))
    bcol = bcol.at[0:C, 5].set(params['b2'].astype(f32))
    bcol = bcol.at[0, 6].set(params['bf'].astype(f32)[0])

    # Host-precomputed tap-validity masks (shared by both dilated layers): for flat
    # position p = h*W + w and offset (dh, dw), valid iff the source pixel is in-image.
    pos = np.arange(HWp)
    hh, ww = pos // W, pos % W
    in_img = pos < HW
    tmask = np.zeros((9, HWp), np.float32)
    t = 0
    for dh in (-d, 0, d):
        for dw in (-d, 0, d):
            tmask[t] = (in_img & (hh + dh >= 0) & (hh + dh < H)
                        & (ww + dw >= 0) & (ww + dw < W))
            t += 1
    tmask = jnp.asarray(tmask)

    # Explicit scoped-VMEM budget (review: v5e default is only 16 MiB).
    itemsize = jnp.dtype(out_dtype).itemsize
    io_bytes = 2 * 2 * C * HWp * itemsize                        # x/out blocks, double-buffered
    w_bytes = 2 * 4 * int(wcat.size + w2p.size + wd.size + bcol.size + tmask.size)
    tmp_bytes = 4 * HWp * (13 * Crp + 3 * C)                     # rough live f32 temporaries
    vmem_limit = int(min(64 << 20, max(32 << 20, io_bytes + w_bytes + tmp_bytes + (4 << 20))))

    kernel = functools.partial(cbam_fused_kernel, C=C, Cr=Cr, Crp=Crp,
                               H=H, W=W, HW=HW, HWp=HWp, d=d)

    def const_spec(a):
        return pl.BlockSpec(a.shape, lambda b, n=a.ndim: (0,) * n)

    out2 = pl.pallas_call(
        kernel,
        out_shape=jax.ShapeDtypeStruct((B, C, HWp), out_dtype),
        grid=(B,),
        in_specs=[
            pl.BlockSpec((1, C, HWp), lambda b: (b, 0, 0)),      # x, one batch item / step
            const_spec(wcat), const_spec(w2p), const_spec(wd),
            const_spec(bcol), const_spec(tmask),
        ],
        out_specs=pl.BlockSpec((1, C, HWp), lambda b: (b, 0, 0)),
        compiler_params=pltpu.CompilerParams(
            dimension_semantics=("parallel",),                   # megacore on v7x
            vmem_limit_bytes=vmem_limit),
    )(x2, wcat, w2p, wd, bcol, tmask)

    if HWp != HW:
        out2 = out2[:, :, :HW]
    return out2.reshape(B, C, H, W)


# --------------------------------------------------------------------------- #
# Pure-JAX reference (un-folded BN, lax conv) for correctness checking         #
# --------------------------------------------------------------------------- #
def reference(x, p, d=4, eps=1e-5):
    pooled = x.mean(axis=(2, 3))                                     # (B, C)
    h = jnp.maximum(jnp.dot(pooled, p['w1'].T, precision=lax.Precision.HIGHEST) + p['b1'], 0.0)
    ca = jnp.dot(h, p['w2'].T, precision=lax.Precision.HIGHEST) + p['b2']

    def bn(v, g, beta, mu, var):
        inv = g / jnp.sqrt(var + eps)
        return (v - mu[None, :, None, None]) * inv[None, :, None, None] + beta[None, :, None, None]

    r = jnp.einsum('oc,bchw->bohw', p['wr'][:, :, 0, 0], x,
                   precision=lax.Precision.HIGHEST) + p['br'][None, :, None, None]
    r = jnp.maximum(bn(r, p['g0'], p['be0'], p['m0'], p['v0']), 0.0)
    for i in range(2):
        r = lax.conv_general_dilated(r, p[f'wd{i}'], window_strides=(1, 1),
                                     padding=((d, d), (d, d)), rhs_dilation=(d, d),
                                     dimension_numbers=('NCHW', 'OIHW', 'NCHW'),
                                     precision=lax.Precision.HIGHEST)
        r = r + p[f'bd{i}'][None, :, None, None]
        r = jnp.maximum(bn(r, p[f'gd{i}'], p[f'bed{i}'], p[f'md{i}'], p[f'vd{i}']), 0.0)
    s = jnp.einsum('oc,bchw->bohw', p['wf'][:, :, 0, 0], r,
                   precision=lax.Precision.HIGHEST) + p['bf'][None, :, None, None]
    att = 1.0 + jax.nn.sigmoid(ca[:, :, None, None] * s)
    return att * x


# --------------------------------------------------------------------------- #
# Deterministic parameter initialization                                       #
# --------------------------------------------------------------------------- #
def init_params(key, C, Cr):
    ks = iter(jax.random.split(key, 32))

    def nrm(shape, scale=0.2):
        return (scale * jax.random.normal(next(ks), shape)).astype(jnp.float32)

    def bn_params():
        g = 1.0 + nrm((Cr,), 0.1)
        beta = nrm((Cr,), 0.1)
        mu = nrm((Cr,), 0.1)
        var = 0.5 + jax.random.uniform(next(ks), (Cr,), dtype=jnp.float32)
        return g, beta, mu, var

    p = {}
    # ChannelGate MLP: Linear(C, Cr), Linear(Cr, C)     (torch Linear: W is (out, in))
    p['w1'] = nrm((Cr, C)); p['b1'] = nrm((Cr,))
    p['w2'] = nrm((C, Cr)); p['b2'] = nrm((C,))
    # SpatialGate
    p['wr'] = nrm((Cr, C, 1, 1)); p['br'] = nrm((Cr,))
    p['g0'], p['be0'], p['m0'], p['v0'] = bn_params()
    p['wd0'] = nrm((Cr, Cr, 3, 3)); p['bd0'] = nrm((Cr,))
    p['gd0'], p['bed0'], p['md0'], p['vd0'] = bn_params()
    p['wd1'] = nrm((Cr, Cr, 3, 3)); p['bd1'] = nrm((Cr,))
    p['gd1'], p['bed1'], p['md1'], p['vd1'] = bn_params()
    p['wf'] = nrm((1, Cr, 1, 1)); p['bf'] = nrm((1,))
    return p


if __name__ == "__main__":
    # gate_channels=32, reduction_ratio=16 (module default) -> hidden channels Cr=2
    B, C, H, W = 2, 32, 16, 16
    key = jax.random.PRNGKey(0)
    kx, kp = jax.random.split(key)
    x = jax.random.normal(kx, (B, C, H, W), dtype=jnp.float32)
    params = init_params(kp, C, C // 16)

    out = jax.block_until_ready(cbam_forward(x, params))

    ref = reference(x, params)
    np.testing.assert_allclose(np.asarray(out), np.asarray(ref), rtol=1e-3, atol=1e-3)
    print("KERNEL_OK")
</pallas_src>

<mosaic_0001>
module attributes {stable_mosaic.version = 11 : i64} {
  func.func @cbam_fused_kernel(%arg0: i32, %arg1: memref<1x32x256xf32, #tpu.memory_space<vmem>>, %arg2: memref<16x32xf32, #tpu.memory_space<vmem>>, %arg3: memref<32x8xf32, #tpu.memory_space<vmem>>, %arg4: memref<2x8x72xf32, #tpu.memory_space<vmem>>, %arg5: memref<32x8xf32, #tpu.memory_space<vmem>>, %arg6: memref<9x256xf32, #tpu.memory_space<vmem>>, %arg7: memref<1x32x256xf32, #tpu.memory_space<vmem>>) attributes {dimension_semantics = [#tpu.dimension_semantics<parallel>], iteration_bounds = array<i64: 2>, scalar_prefetch = 0 : i64, scratch_operands = 0 : i64, tpu.core_type = #tpu.core_type<tc>, window_params = [{transform_indices = @transform_0, window_bounds = array<i64: 1, 32, 256>}, {pipeline_mode = #tpu.pipeline_mode<synchronous>, transform_indices = @transform_1, window_bounds = array<i64: 16, 32>}, {pipeline_mode = #tpu.pipeline_mode<synchronous>, transform_indices = @transform_2, window_bounds = array<i64: 32, 8>}, {pipeline_mode = #tpu.pipeline_mode<synchronous>, transform_indices = @transform_3, window_bounds = array<i64: 2, 8, 72>}, {pipeline_mode = #tpu.pipeline_mode<synchronous>, transform_indices = @transform_4, window_bounds = array<i64: 32, 8>}, {pipeline_mode = #tpu.pipeline_mode<synchronous>, transform_indices = @transform_5, window_bounds = array<i64: 9, 256>}, {transform_indices = @transform_6, window_bounds = array<i64: 1, 32, 256>}]} {
    %c0 = arith.constant 0 : index
    %c0_0 = arith.constant 0 : index
    %c0_1 = arith.constant 0 : index
    %0 = vector.load %arg1[%c0, %c0_0, %c0_1] : memref<1x32x256xf32, #tpu.memory_space<vmem>>, vector<1x32x256xf32>
    %1 = vector.shape_cast %0 : vector<1x32x256xf32> to vector<32x256xf32>
    %c0_2 = arith.constant 0 : index
    %c0_3 = arith.constant 0 : index
    %2 = vector.load %arg5[%c0_2, %c0_3] : memref<32x8xf32, #tpu.memory_space<vmem>>, vector<32x8xf32>
    %3 = vector.extract_strided_slice %2 {offsets = [0, 0], sizes = [8, 1], strides = [1, 1]} : vector<32x8xf32> to vector<8x1xf32>
    %4 = vector.extract_strided_slice %2 {offsets = [0, 1], sizes = [8, 1], strides = [1, 1]} : vector<32x8xf32> to vector<8x1xf32>
    %5 = vector.extract_strided_slice %2 {offsets = [0, 2], sizes = [8, 1], strides = [1, 1]} : vector<32x8xf32> to vector<8x1xf32>
    %6 = vector.extract_strided_slice %2 {offsets = [0, 3], sizes = [8, 1], strides = [1, 1]} : vector<32x8xf32> to vector<8x1xf32>
    %7 = vector.extract_strided_slice %2 {offsets = [0, 4], sizes = [8, 1], strides = [1, 1]} : vector<32x8xf32> to vector<8x1xf32>
    %8 = vector.extract_strided_slice %2 {offsets = [0, 5], sizes = [32, 1], strides = [1, 1]} : vector<32x8xf32> to vector<32x1xf32>
    %9 = vector.extract_strided_slice %2 {offsets = [0, 6], sizes = [1, 1], strides = [1, 1]} : vector<32x8xf32> to vector<1x1xf32>
    %c0_4 = arith.constant 0 : index
    %c0_5 = arith.constant 0 : index
    %10 = vector.load %arg2[%c0_4, %c0_5] : memref<16x32xf32, #tpu.memory_space<vmem>>, vector<16x32xf32>
    %cst = arith.constant dense<0.000000e+00> : vector<16x256xf32>
    %11 = tpu.matmul %10, %1, %cst {dimension_numbers = #tpu.dot_dimension_numbers<[1], [0], [0], [1], [0, 0, 1, 1], [], []>, precision = #tpu.contract_precision<fp32>} : vector<16x32xf32>, vector<32x256xf32>, vector<16x256xf32> -> vector<16x256xf32>
    %12 = vector.extract_strided_slice %11 {offsets = [8, 0], sizes = [8, 256], strides = [1, 1]} : vector<16x256xf32> to vector<8x256xf32>
    %cst_6 = arith.constant dense<0.000000e+00> : vector<8xf32>
    %13 = vector.multi_reduction <add>, %12, %cst_6 [1] : vector<8x256xf32> to vector<8xf32>
    %14 = vector.shape_cast %13 : vector<8xf32> to vector<8x1xf32>
    %cst_7 = arith.constant 3.906250e-03 : f32
    %15 = vector.broadcast %cst_7 : f32 to vector<8x1xf32>
    %16 = arith.mulf %14, %15 : vector<8x1xf32>
    %17 = arith.addf %16, %4 : vector<8x1xf32>
    %cst_8 = arith.constant 0.000000e+00 : f32
    %18 = vector.broadcast %cst_8 : f32 to vector<8x1xf32>
    %19 = arith.maximumf %17, %18 : vector<8x1xf32>
    %20 = vector.extract_strided_slice %11 {offsets = [0, 0], sizes = [8, 256], strides = [1, 1]} : vector<16x256xf32> to vector<8x256xf32>
    %21 = vector.broadcast %3 : vector<8x1xf32> to vector<8x256xf32>
    %22 = arith.addf %20, %21 : vector<8x256xf32>
    %cst_9 = arith.constant 0.000000e+00 : f32
    %23 = vector.broadcast %cst_9 : f32 to vector<8x256xf32>
    %24 = arith.maximumf %22, %23 : vector<8x256xf32>
    %c0_10 = arith.constant 0 : index
    %c0_11 = arith.constant 0 : index
    %25 = vector.load %arg6[%c0_10, %c0_11] : memref<9x256xf32, #tpu.memory_space<vmem>>, vector<9x256xf32>
    %c68_i32 = arith.constant 68 : i32
    %26 = tpu.dynamic_rotate %24 by %c68_i32 dim 1 : vector<8x256xf32>, i32 -> vector<8x256xf32>
    %27 = vector.extract_strided_slice %25 {offsets = [0, 0], sizes = [1, 256], strides = [1, 1]} : vector<9x256xf32> to vector<1x256xf32>
    %28 = vector.broadcast %27 : vector<1x256xf32> to vector<8x256xf32>
    %29 = arith.mulf %26, %28 : vector<8x256xf32>
    %c64_i32 = arith.constant 64 : i32
    %30 = tpu.dynamic_rotate %24 by %c64_i32 dim 1 : vector<8x256xf32>, i32 -> vector<8x256xf32>
    %31 = vector.extract_strided_slice %25 {offsets = [1, 0], sizes = [1, 256], strides = [1, 1]} : vector<9x256xf32> to vector<1x256xf32>
    %32 = vector.broadcast %31 : vector<1x256xf32> to vector<8x256xf32>
    %33 = arith.mulf %30, %32 : vector<8x256xf32>
    %c60_i32 = arith.constant 60 : i32
    %34 = tpu.dynamic_rotate %24 by %c60_i32 dim 1 : vector<8x256xf32>, i32 -> vector<8x256xf32>
    %35 = vector.extract_strided_slice %25 {offsets = [2, 0], sizes = [1, 256], strides = [1, 1]} : vector<9x256xf32> to vector<1x256xf32>
    %36 = vector.broadcast %35 : vector<1x256xf32> to vector<8x256xf32>
    %37 = arith.mulf %34, %36 : vector<8x256xf32>
    %c4_i32 = arith.constant 4 : i32
    %38 = tpu.dynamic_rotate %24 by %c4_i32 dim 1 : vector<8x256xf32>, i32 -> vector<8x256xf32>
    %39 = vector.extract_strided_slice %25 {offsets = [3, 0], sizes = [1, 256], strides = [1, 1]} : vector<9x256xf32> to vector<1x256xf32>
    %40 = vector.broadcast %39 : vector<1x256xf32> to vector<8x256xf32>
    %41 = arith.mulf %38, %40 : vector<8x256xf32>
    %c252_i32 = arith.constant 252 : i32
    %42 = tpu.dynamic_rotate %24 by %c252_i32 dim 1 : vector<8x256xf32>, i32 -> vector<8x256xf32>
    %43 = vector.extract_strided_slice %25 {offsets = [5, 0], sizes = [1, 256], strides = [1, 1]} : vector<9x256xf32> to vector<1x256xf32>
    %44 = vector.broadcast %43 : vector<1x256xf32> to vector<8x256xf32>
    %45 = arith.mulf %42, %44 : vector<8x256xf32>
    %c196_i32 = arith.constant 196 : i32
    %46 = tpu.dynamic_rotate %24 by %c196_i32 dim 1 : vector<8x256xf32>, i32 -> vector<8x256xf32>
    %47 = vector.extract_strided_slice %25 {offsets = [6, 0], sizes = [1, 256], strides = [1, 1]} : vector<9x256xf32> to vector<1x256xf32>
    %48 = vector.broadcast %47 : vector<1x256xf32> to vector<8x256xf32>
    %49 = arith.mulf %46, %48 : vector<8x256xf32>
    %c192_i32 = arith.constant 192 : i32
    %50 = tpu.dynamic_rotate %24 by %c192_i32 dim 1 : vector<8x256xf32>, i32 -> vector<8x256xf32>
    %51 = vector.extract_strided_slice %25 {offsets = [7, 0], sizes = [1, 256], strides = [1, 1]} : vector<9x256xf32> to vector<1x256xf32>
    %52 = vector.broadcast %51 : vector<1x256xf32> to vector<8x256xf32>
    %53 = arith.mulf %50, %52 : vector<8x256xf32>
    %c188_i32 = arith.constant 188 : i32
    %54 = tpu.dynamic_rotate %24 by %c188_i32 dim 1 : vector<8x256xf32>, i32 -> vector<8x256xf32>
    %55 = vector.extract_strided_slice %25 {offsets = [8, 0], sizes = [1, 256], strides = [1, 1]} : vector<9x256xf32> to vector<1x256xf32>
    %56 = vector.broadcast %55 : vector<1x256xf32> to vector<8x256xf32>
    %57 = arith.mulf %54, %56 : vector<8x256xf32>
    %58 = tpu.concatenate %29, %33, %37, %41, %24, %45, %49, %53, %57 in 0 : vector<8x256xf32>, vector<8x256xf32>, vector<8x256xf32>, vector<8x256xf32>, vector<8x256xf32>, vector<8x256xf32>, vector<8x256xf32>, vector<8x256xf32>, vector<8x256xf32> -> vector<72x256xf32>
    %c0_12 = arith.constant 0 : index
    %c0_13 = arith.constant 0 : index
    %c0_14 = arith.constant 0 : index
    %59 = vector.load %arg4[%c0_12, %c0_13, %c0_14] : memref<2x8x72xf32, #tpu.memory_space<vmem>>, vector<1x8x72xf32>
    %60 = vector.shape_cast %59 : vector<1x8x72xf32> to vector<8x72xf32>
    %cst_15 = arith.constant dense<0.000000e+00> : vector<8x256xf32>
    %61 = tpu.matmul %60, %58, %cst_15 {dimension_numbers = #tpu.dot_dimension_numbers<[1], [0], [0], [1], [0, 0, 1, 1], [], []>, precision = #tpu.contract_precision<fp32>} : vector<8x72xf32>, vector<72x256xf32>, vector<8x256xf32> -> vector<8x256xf32>
    %62 = vector.broadcast %5 : vector<8x1xf32> to vector<8x256xf32>
    %63 = arith.addf %61, %62 : vector<8x256xf32>
    %cst_16 = arith.constant 0.000000e+00 : f32
    %64 = vector.broadcast %cst_16 : f32 to vector<8x256xf32>
    %65 = arith.maximumf %63, %64 : vector<8x256xf32>
    %c68_i32_17 = arith.constant 68 : i32
    %66 = tpu.dynamic_rotate %65 by %c68_i32_17 dim 1 : vector<8x256xf32>, i32 -> vector<8x256xf32>
    %67 = vector.extract_strided_slice %25 {offsets = [0, 0], sizes = [1, 256], strides = [1, 1]} : vector<9x256xf32> to vector<1x256xf32>
    %68 = vector.broadcast %67 : vector<1x256xf32> to vector<8x256xf32>
    %69 = arith.mulf %66, %68 : vector<8x256xf32>
    %c64_i32_18 = arith.constant 64 : i32
    %70 = tpu.dynamic_rotate %65 by %c64_i32_18 dim 1 : vector<8x256xf32>, i32 -> vector<8x256xf32>
    %71 = vector.extract_strided_slice %25 {offsets = [1, 0], sizes = [1, 256], strides = [1, 1]} : vector<9x256xf32> to vector<1x256xf32>
    %72 = vector.broadcast %71 : vector<1x256xf32> to vector<8x256xf32>
    %73 = arith.mulf %70, %72 : vector<8x256xf32>
    %c60_i32_19 = arith.constant 60 : i32
    %74 = tpu.dynamic_rotate %65 by %c60_i32_19 dim 1 : vector<8x256xf32>, i32 -> vector<8x256xf32>
    %75 = vector.extract_strided_slice %25 {offsets = [2, 0], sizes = [1, 256], strides = [1, 1]} : vector<9x256xf32> to vector<1x256xf32>
    %76 = vector.broadcast %75 : vector<1x256xf32> to vector<8x256xf32>
    %77 = arith.mulf %74, %76 : vector<8x256xf32>
    %c4_i32_20 = arith.constant 4 : i32
    %78 = tpu.dynamic_rotate %65 by %c4_i32_20 dim 1 : vector<8x256xf32>, i32 -> vector<8x256xf32>
    %79 = vector.extract_strided_slice %25 {offsets = [3, 0], sizes = [1, 256], strides = [1, 1]} : vector<9x256xf32> to vector<1x256xf32>
    %80 = vector.broadcast %79 : vector<1x256xf32> to vector<8x256xf32>
    %81 = arith.mulf %78, %80 : vector<8x256xf32>
    %c252_i32_21 = arith.constant 252 : i32
    %82 = tpu.dynamic_rotate %65 by %c252_i32_21 dim 1 : vector<8x256xf32>, i32 -> vector<8x256xf32>
    %83 = vector.extract_strided_slice %25 {offsets = [5, 0], sizes = [1, 256], strides = [1, 1]} : vector<9x256xf32> to vector<1x256xf32>
    %84 = vector.broadcast %83 : vector<1x256xf32> to vector<8x256xf32>
    %85 = arith.mulf %82, %84 : vector<8x256xf32>
    %c196_i32_22 = arith.constant 196 : i32
    %86 = tpu.dynamic_rotate %65 by %c196_i32_22 dim 1 : vector<8x256xf32>, i32 -> vector<8x256xf32>
    %87 = vector.extract_strided_slice %25 {offsets = [6, 0], sizes = [1, 256], strides = [1, 1]} : vector<9x256xf32> to vector<1x256xf32>
    %88 = vector.broadcast %87 : vector<1x256xf32> to vector<8x256xf32>
    %89 = arith.mulf %86, %88 : vector<8x256xf32>
    %c192_i32_23 = arith.constant 192 : i32
    %90 = tpu.dynamic_rotate %65 by %c192_i32_23 dim 1 : vector<8x256xf32>, i32 -> vector<8x256xf32>
    %91 = vector.extract_strided_slice %25 {offsets = [7, 0], sizes = [1, 256], strides = [1, 1]} : vector<9x256xf32> to vector<1x256xf32>
    %92 = vector.broadcast %91 : vector<1x256xf32> to vector<8x256xf32>
    %93 = arith.mulf %90, %92 : vector<8x256xf32>
    %c188_i32_24 = arith.constant 188 : i32
    %94 = tpu.dynamic_rotate %65 by %c188_i32_24 dim 1 : vector<8x256xf32>, i32 -> vector<8x256xf32>
    %95 = vector.extract_strided_slice %25 {offsets = [8, 0], sizes = [1, 256], strides = [1, 1]} : vector<9x256xf32> to vector<1x256xf32>
    %96 = vector.broadcast %95 : vector<1x256xf32> to vector<8x256xf32>
    %97 = arith.mulf %94, %96 : vector<8x256xf32>
    %98 = tpu.concatenate %69, %73, %77, %81, %65, %85, %89, %93, %97 in 0 : vector<8x256xf32>, vector<8x256xf32>, vector<8x256xf32>, vector<8x256xf32>, vector<8x256xf32>, vector<8x256xf32>, vector<8x256xf32>, vector<8x256xf32>, vector<8x256xf32> -> vector<72x256xf32>
    %c1 = arith.constant 1 : index
    %c0_25 = arith.constant 0 : index
    %c0_26 = arith.constant 0 : index
    %99 = vector.load %arg4[%c1, %c0_25, %c0_26] : memref<2x8x72xf32, #tpu.memory_space<vmem>>, vector<1x8x72xf32>
    %100 = vector.shape_cast %99 : vector<1x8x72xf32> to vector<8x72xf32>
    %cst_27 = arith.constant dense<0.000000e+00> : vector<8x256xf32>
    %101 = tpu.matmul %100, %98, %cst_27 {dimension_numbers = #tpu.dot_dimension_numbers<[1], [0], [0], [1], [0, 0, 1, 1], [], []>, precision = #tpu.contract_precision<fp32>} : vector<8x72xf32>, vector<72x256xf32>, vector<8x256xf32> -> vector<8x256xf32>
    %102 = vector.broadcast %6 : vector<8x1xf32> to vector<8x256xf32>
    %103 = arith.addf %101, %102 : vector<8x256xf32>
    %cst_28 = arith.constant 0.000000e+00 : f32
    %104 = vector.broadcast %cst_28 : f32 to vector<8x256xf32>
    %105 = arith.maximumf %103, %104 : vector<8x256xf32>
    %106 = vector.broadcast %7 : vector<8x1xf32> to vector<8x256xf32>
    %107 = arith.mulf %105, %106 : vector<8x256xf32>
    %cst_29 = arith.constant dense<0.000000e+00> : vector<256xf32>
    %108 = vector.multi_reduction <add>, %107, %cst_29 [0] : vector<8x256xf32> to vector<256xf32>
    %109 = vector.shape_cast %108 : vector<256xf32> to vector<1x256xf32>
    %110 = vector.broadcast %9 : vector<1x1xf32> to vector<1x256xf32>
    %111 = arith.addf %109, %110 : vector<1x256xf32>
    %112 = vector.broadcast %19 : vector<8x1xf32> to vector<8x256xf32>
    %113 = vector.broadcast %111 : vector<1x256xf32> to vector<8x256xf32>
    %114 = arith.mulf %112, %113 : vector<8x256xf32>
    %115 = vector.broadcast %8 : vector<32x1xf32> to vector<32x256xf32>
    %116 = vector.broadcast %111 : vector<1x256xf32> to vector<32x256xf32>
    %117 = arith.mulf %115, %116 : vector<32x256xf32>
    %c0_30 = arith.constant 0 : index
    %c0_31 = arith.constant 0 : index
    %118 = vector.load %arg3[%c0_30, %c0_31] : memref<32x8xf32, #tpu.memory_space<vmem>>, vector<32x8xf32>
    %119 = vector.extract_strided_slice %118 {offsets = [0, 0], sizes = [32, 1], strides = [1, 1]} : vector<32x8xf32> to vector<32x1xf32>
    %120 = vector.extract_strided_slice %114 {offsets = [0, 0], sizes = [1, 256], strides = [1, 1]} : vector<8x256xf32> to vector<1x256xf32>
    %121 = vector.broadcast %119 : vector<32x1xf32> to vector<32x256xf32>
    %122 = vector.broadcast %120 : vector<1x256xf32> to vector<32x256xf32>
    %123 = arith.mulf %121, %122 : vector<32x256xf32>
    %124 = arith.addf %117, %123 : vector<32x256xf32>
    %125 = vector.extract_strided_slice %118 {offsets = [0, 1], sizes = [32, 1], strides = [1, 1]} : vector<32x8xf32> to vector<32x1xf32>
    %126 = vector.extract_strided_slice %114 {offsets = [1, 0], sizes = [1, 256], strides = [1, 1]} : vector<8x256xf32> to vector<1x256xf32>
    %127 = vector.broadcast %125 : vector<32x1xf32> to vector<32x256xf32>
    %128 = vector.broadcast %126 : vector<1x256xf32> to vector<32x256xf32>
    %129 = arith.mulf %127, %128 : vector<32x256xf32>
    %130 = arith.addf %124, %129 : vector<32x256xf32>
    %cst_32 = arith.constant 5.000000e-01 : f32
    %131 = vector.broadcast %cst_32 : f32 to vector<32x256xf32>
    %132 = arith.mulf %131, %130 : vector<32x256xf32>
    %133 = math.tanh %132 : vector<32x256xf32>
    %cst_33 = arith.constant 5.000000e-01 : f32
    %134 = vector.broadcast %cst_33 : f32 to vector<32x256xf32>
    %135 = arith.mulf %134, %133 : vector<32x256xf32>
    %cst_34 = arith.constant 1.500000e+00 : f32
    %136 = vector.broadcast %cst_34 : f32 to vector<32x256xf32>
    %137 = arith.addf %136, %135 : vector<32x256xf32>
    %138 = arith.mulf %137, %1 : vector<32x256xf32>
    %c0_35 = arith.constant 0 : index
    %c0_36 = arith.constant 0 : index
    %c0_37 = arith.constant 0 : index
    %139 = vector.load %arg7[%c0_35, %c0_36, %c0_37] : memref<1x32x256xf32, #tpu.memory_space<vmem>>, vector<1x32x256xf32>
    %140 = vector.shape_cast %139 : vector<1x32x256xf32> to vector<32x256xf32>
    %141 = vector.shape_cast %138 : vector<32x256xf32> to vector<1x32x256xf32>
    tpu.vector_store %arg7[%c0_35, %c0_36, %c0_37], %141 {strides = array<i32>} : memref<1x32x256xf32, #tpu.memory_space<vmem>>, vector<1x32x256xf32>,
    return
  }
  func.func @transform_0(%arg0: i32) -> (i32, i32, i32) {
    %c0_i32 = arith.constant 0 : i32
    %c0_i32_0 = arith.constant 0 : i32
    %c0_i32_1 = arith.constant 0 : i32
    return %arg0, %c0_i32, %c0_i32_0 : i32, i32, i32
  }
  func.func @transform_1(%arg0: i32) -> (i32, i32) {
    %c0_i32 = arith.constant 0 : i32
    %c0_i32_0 = arith.constant 0 : i32
    %c0_i32_1 = arith.constant 0 : i32
    return %c0_i32, %c0_i32_0 : i32, i32
  }
  func.func @transform_2(%arg0: i32) -> (i32, i32) {
    %c0_i32 = arith.constant 0 : i32
    %c0_i32_0 = arith.constant 0 : i32
    %c0_i32_1 = arith.constant 0 : i32
    return %c0_i32, %c0_i32_0 : i32, i32
  }
  func.func @transform_3(%arg0: i32) -> (i32, i32, i32) {
    %c0_i32 = arith.constant 0 : i32
    %c0_i32_0 = arith.constant 0 : i32
    %c0_i32_1 = arith.constant 0 : i32
    %c0_i32_2 = arith.constant 0 : i32
    return %c0_i32, %c0_i32_0, %c0_i32_1 : i32, i32, i32
  }
  func.func @transform_4(%arg0: i32) -> (i32, i32) {
    %c0_i32 = arith.constant 0 : i32
    %c0_i32_0 = arith.constant 0 : i32
    %c0_i32_1 = arith.constant 0 : i32
    return %c0_i32, %c0_i32_0 : i32, i32
  }
  func.func @transform_5(%arg0: i32) -> (i32, i32) {
    %c0_i32 = arith.constant 0 : i32
    %c0_i32_0 = arith.constant 0 : i32
    %c0_i32_1 = arith.constant 0 : i32
    return %c0_i32, %c0_i32_0 : i32, i32
  }
  func.func @transform_6(%arg0: i32) -> (i32, i32, i32) {
    %c0_i32 = arith.constant 0 : i32
    %c0_i32_0 = arith.constant 0 : i32
    %c0_i32_1 = arith.constant 0 : i32
    return %arg0, %c0_i32, %c0_i32_0 : i32, i32, i32
  }
}

</mosaic_0001>

<bundles_post_ra>
// kernel: tpu_custom_call.1
= control target key start
LH: loop header
LB: loop body
LE: loop exit
PB: predicated region body
PF: predicated region fallthrough
CT: control target
= control target key end

     0   :  { %11 = vsyncpa [#allocation3], 0  ;;  %s4395_s0 = inlined_call_operand.hbm [shape: f32[2,32,256], index: 0, kind: input, shape index: {}]   ;;  %s4396_s1 = inlined_call_operand.vmem [shape: f32[16,32], index: 1, kind: input, shape index: {}]   ;;  %s4397_s2 = inlined_call_operand.vmem [shape: f32[32,8], index: 2, kind: input, shape index: {}]   ;;  %s4398_s3 = inlined_call_operand.vmem [shape: f32[2,8,72], index: 3, kind: input, shape index: {}]   ;;  %s4399_s4 = inlined_call_operand.vmem [shape: f32[32,8], index: 4, kind: input, shape index: {}]   ;;  %s4400_s5 = inlined_call_operand.vmem [shape: f32[9,256], index: 5, kind: input, shape index: {}]   ;;  %s4401_s6 = inlined_call_operand.hbm [shape: f32[2,32,256], index: 6, kind: output, shape index: {}]  }
   0x1   :  { %13 = vsyncpa [#allocation3 + $0x1], 0 }
   0x2   :  { %14 = vsyncpa [#allocation4], 0 }
   0x3   :  { %16 = vsyncpa [#allocation4 + $0x1], 0  ;;  %s3275_s21 = smov 0   ;;  %s3277_s22 = smov 0  }
   0x4   :  { %s3279_s23 = smov 0   ;;  %s3281_s24 = smov 0  }
   0x5 LB: > { %s3296_s25 = sadd.s32 4294967295, %s3219_s24   ;;  %s2722_s26 = sadd.s32 4294967294, %s3219_s24   ;;  %s3219_s24 = sphi %s3281_s24, %s4504_s24   ;;  %s3215_s23 = sphi %s3279_s23, %s4503_s23   ;;  %s3211_s22 = sphi %s3277_s22, %s4502_s22   ;;  %s3207_s21 = sphi %s3275_s21, %s4501_s21  }
   0x6   : > { %s3300_s27 = sadd.s32 1, %s3219_s24   ;;  %s29_s28 = sadd.s32 1, %s3215_s23 }
   0x7   : > { %s26_s29 = ssub.s32 %s3219_s24, %s3300_s27  ;;  %p36_p0 = scmp.ne.s32.totalorder %s3215_s23, %s3211_s22 }
   0x8   : > { %p27_p1 = scmp.eq.s32.totalorder %s26_s29, 0  ;;  %p37_p2 = scmp.eq.s32.totalorder %s3219_s24, 0 }
   0x9   : > { %p42_p3 = scmp.ne.s32.totalorder %s3211_s22, %s3207_s21  ;;  %p43_p4 = scmp.eq.s32.totalorder %s3296_s25, 0 }
   0xa   : > { %s3312_s30 = scalar_select %p27_p1, %s3215_s23, %s29_s28  }
   0xb   : > { %p3314_p5 = por %p37_p2, %p36_p0  ;;  %p3318_p6 = por %p43_p4, %p42_p3 }
   0xc   : > { %p171_p7 = scmp.eq.s32.totalorder %s3296_s25, 1  ;;  %p177_p8 = scmp.eq.s32.totalorder %s2722_s26, 1 }
   0xd   : > { %p3037_p10 = scmp.lt.s32.totalorder %s3219_s24, 2  ;;  %s212_s11 = sand.u32 1, %s3215_s23  }
   0xe   : > { %p3325_p11 = por %p171_p7, %p36_p0  ;;  %p3329_p12 = por %p177_p8, %p42_p3 }
   0xf   : > { %s2739_s12 = sshll.u32 %s3219_s24, 10  ;;  %s2725_s13 = sshll.u32 %s212_s11, 6 }
  0x10   : > { %s4436_s9 = scalar_select %p3325_p11, 1, 0 }
  0x11   : > { %s4437_s10 = scalar_select %p3329_p12, 1, 0 }
  0x12   : > { %s3338_s16 = scalar_lea.hbm %s4395_s0, %s2739_s12  ;;  %s216_s17 = scalar_lea.vmem [#allocation2], %s2725_s13 }
  0x13   : > { %s223_s18 = sshll.u32 %s216_s17, 4  ;;  %p3342_p13 = pnand %p3037_p10, %p3314_p5  ;;  %s3346_s18 = int_to_ptr.vmem [resolvable:$true] %s223_s18 }
  0x14   : > { %s3348_s20 = scalar_lea.sflag [#allocation3], %s212_s11  ;;  %s3123_s26 = scalar_lea.hbm %s3338_s16, 1024 }
  0x15   : > { %p3124_p0 = scmp.ne.s32.totalorder %s3338_s16, %s3123_s26  ;;  %p3125_p1 = pneg %p3342_p13 }
  0x16   : > { %s3128_s7 = scalar_lea.hbm %s4395_s0, 2048  ;;  %p3129_p4 = scmp.lt.u32.totalorder %s3338_s16, %s4395_s0 }
  0x17   : > { %p3126_p2 = pnand %p3125_p1, %p3124_p0  ;;  %p3130_p5 = scmp.lt.u32.totalorder %s3128_s7, %s3123_s26 }
  0x18   : > { %p3132_p8 = scmp.lt.u32.totalorder %s3123_s26, %s3338_s16 }
  0x19   : > { %p3127_p3 = pneg %p3126_p2  ;;  %p3131_p7 = por %p3130_p5, %p3129_p4 }
  0x1b   : > { %p3133_p10 = por %p3132_p8, %p3131_p7 }
  0x1d   : > { %p3134_p9 = pnand %p3133_p10, %p3127_p3 }
  0x1f   : > { %3137 = shalt.err (!%p3134_p9)
}
  0x20   : > { %s3138_s11 = scalar_lea.vmem %s3346_s18, 1024  ;;  %s3221_s14 = smov [#allocation2]  }
  0x21   : > { %p3139_p0 = scmp.ne.s32.totalorder %s3346_s18, %s3138_s11  ;;  %s3143_s15 = sshll.u32 %s3221_s14, 4  ;;  %s3144_s15 = int_to_ptr.vmem [resolvable:$false] %s3143_s15 }
  0x22   : > { %s3145_s17 = scalar_lea.vmem %s3144_s15, 2048  ;;  %p3146_p11 = scmp.lt.s32.totalorder %s3346_s18, %s3144_s15 }
  0x23   : > { %p3141_p2 = pnand %p3139_p0, %p3125_p1  ;;  %p3147_p4 = scmp.lt.s32.totalorder %s3145_s17, %s3138_s11 }
  0x25   : > { %p3142_p12 = pneg %p3141_p2  ;;  %p3148_p5 = por %p3147_p4, %p3146_p11 }
  0x27   : > { %p3149_p7 = pnand %p3148_p5, %p3142_p12 }
  0x29   : > { %3152 = shalt.err (!%p3149_p7)
}
  0x2a   : > { %s3222_s26 = smov 256   ;;  %s3223_s28 = smov 16  }
  0x2b   : > { %3032 = dma.hbm_to_vmem [thread:$0]  (!%p3342_p13), %s3338_s16, 1024, %s3346_s18, %s3348_s20, %s3222_s26, %s3222_s26, %s3223_s28  }
  0x2c   : > { %p2728_p9 = scmp.ge.s32.totalorder %s3219_s24, 1  ;;  %p231_p1 = scmp.lt.s32.totalorder %s3219_s24, 3 }
  0x2e   : > { %p232_p3 = pnand %p2728_p9, %p231_p1 }
  0x30   : > { %235 = sbr.rel (%p232_p3) target bundleno = 1304 (0x518), region = 44 }
  0x37   : > { %s3379_s29 = sand.u32 1, %s3211_s22  }
  0x38   : > { %s2729_s7 = sshll.u32 %s3379_s29, 6  ;;  %s238_s12 = scalar_lea.sflag [#allocation3], %s3379_s29 }
  0x39   : > { %s3385_s13 = scalar_lea.vmem [#allocation2], %s2729_s7 }
  0x3a   : > { %3198 = dma.done.wait (%p3318_p6), %s238_s12, 1024  }
  0x3b   : > { %3200 = vsyncadd (%p3318_p6), %s238_s12, 4294966272  ;;  %v4404_v0 = vmov 0.0   ;;  %v4403_v1 = vmov 0   ;;  %v3395_v2 = vld [vmem:[%s3385_s13 + $0x8] sm:$0xff]  ;;  %v3398_v3 = vld [vmem:[%s3385_s13 + $0x18] sm:$0xff]  ;;  %vm284_vm0 = vcmask 261120  }
  0x3c   : > { %490 = vmatprep.mubr.f32.mxu0 %v4404_v0  ;;  %363 = vmatprep.mubr.f32.mxu1 %v4404_v0  ;;  %v3401_v4 = vld [vmem:[%s3385_s13] sm:$0xff]  ;;  %v291_v5 = vand.u32 4294901760, %v3395_v2  ;;  %v295_v6 = vand.u32 4294901760, %v3398_v3  ;;  %v3406_v7 = vld [vmem:[%s3385_s13 + $0x10] sm:$0xff]  ;;  %v3410_v9 = vld [vmem:[%s3385_s13 + $0x28] sm:$0xff]  ;;  %s3226_s14 = smov 64  }
  0x3d   : > { %3088 = vset.pattern.permute.xlu0 %v4403_v1  ;;  %v293_v8 = vand.u32 4294901760, %v3401_v4  ;;  %v277_v10 = vld [vmem:[%s3385_s13 + $0x38] sm:$0xff]  ;;  %v297_v11 = vand.u32 4294901760, %v3406_v7  ;;  %v299_v12 = vand.u32 4294901760, %v3410_v9  ;;  %v3416_v14 = vld [vmem:[%s3385_s13 + $0x20] sm:$0xff]  ;;  %v3419_v15 = vld [vmem:[%s3385_s13 + $0x30] sm:$0xff] }
  0x3e   : > { %v303_v13 = vand.u32 4294901760, %v277_v10  ;;  %v3422_v16 = vsub.f32 %v3395_v2, %v291_v5  ;;  %v3425_v17 = vsub.f32 %v3398_v3, %v295_v6  ;;  %v301_v19 = vand.u32 4294901760, %v3416_v14  ;;  %v3434_v20 = vld [vmem:[%s4399_s4] sm:$0xff]  ;;  %v283_v50 = vld [vmem:[%s4396_s1 + $0x8] sm:$0xff]  ;;  %s3227_s15 = smov 68   ;;  %s3228_s17 = smov 60  }
  0x3f   : > { %v3428_v18 = vsub.f32 %v3401_v4, %v293_v8  ;;  %v3437_v21 = vsub.f32 %v3406_v7, %v297_v11  ;;  %v3440_v22 = vsub.f32 %v3410_v9, %v299_v12  ;;  %v305_v24 = vand.u32 4294901760, %v3419_v15  ;;  %891 = vperm.xlu0 %3088, %v3434_v20   ;;  %v282_v41 = vld [vmem:[%s4396_s1] sm:$0xff]  ;;  %s3229_s26 = smov 4   ;;  %s3230_s28 = smov 124  }
  0x40   : > { %v3442_v23 = vsub.f32 %v277_v10, %v303_v13  ;;  %v388_v25 = vand.u32 4294901760, %v3422_v16  ;;  %v400_v26 = vand.u32 4294901760, %v3425_v17  ;;  %v3450_v28 = vsub.f32 %v3416_v14, %v301_v19  ;;  %s269_s19 = scalar_lea.vmem [#allocation5], %s2729_s7  ;;  %s2740_s20 = sshll.u32 %s3296_s25, 10 }
  0x41   : > { %v394_v27 = vand.u32 4294901760, %v3428_v18  ;;  %v406_v29 = vand.u32 4294901760, %v3437_v21  ;;  %v412_v30 = vand.u32 4294901760, %v3440_v22  ;;  %v3456_v32 = vsub.f32 %v3419_v15, %v305_v24  ;;  %s2649_s11 = sshll.u32 %s269_s19, 4  ;;  %s4348_s8 = scalar_lea.hbm %s4401_s6, %s2740_s20  ;;  %s4350_s11 = int_to_ptr.vmem [resolvable:$true] %s2649_s11 }
  0x42   : > { %v424_v31 = vand.u32 4294901760, %v3442_v23  ;;  %v389_v33 = vsub.f32 %v3422_v16, %v388_v25  ;;  %v401_v34 = vsub.f32 %v3425_v17, %v400_v26  ;;  %v418_v36 = vand.u32 4294901760, %v3450_v28  ;;  %s2636_s25 = scalar_lea.sflag [#allocation4], %s3379_s29  ;;  %s3153_s16 = scalar_lea.vmem %s4350_s11, 1024 }
  0x43   : > { %v395_v35 = vsub.f32 %v3428_v18, %v394_v27  ;;  %v407_v37 = vsub.f32 %v3437_v21, %v406_v29  ;;  %v413_v38 = vsub.f32 %v3440_v22, %v412_v30  ;;  %v430_v40 = vand.u32 4294901760, %v3456_v32  ;;  %p3154_p6 = scmp.ne.s32.totalorder %s4350_s11, %s3153_s16  ;;  %p4498_p11 = scmp.ne.s32.totalorder %s4436_s9, 0 }
  0x44   : > { %v425_v39 = vsub.f32 %v3442_v23, %v424_v31  ;;  %v390_v42 = vand.u32 4294901760, %v389_v33  ;;  %v402_v43 = vand.u32 4294901760, %v401_v34  ;;  %v419_v45 = vsub.f32 %v3450_v28, %v418_v36 }
  0x45   : > { %v396_v44 = vand.u32 4294901760, %v395_v35  ;;  %v408_v46 = vand.u32 4294901760, %v407_v37  ;;  %v414_v47 = vand.u32 4294901760, %v413_v38  ;;  %v431_v49 = vsub.f32 %v3456_v32, %v430_v40  ;;  %p3155_p12 = pnand %p3154_p6, %p4498_p11 }
  0x46   : > { %v426_v48 = vand.u32 4294901760, %v425_v39  ;;  %v2749_v51 = vpack.c.bf16 %v402_v43, %v390_v42  ;;  %v420_v52 = vand.u32 4294901760, %v419_v45  ;;  %v286_v53 = vsel %vm284_vm0, %v282_v41, 0 }
  0x47   : > { %v2751_v54 = vpack.c.bf16 %v408_v46, %v396_v44  ;;  %v432_v56 = vand.u32 4294901760, %v431_v49  ;;  %v3491_v57 = vand.u32 4294901760, %v286_v53  ;;  %v289_v58 = vsel %vm284_vm0, %v283_v50, 0  ;;  %v898_v46 = vld [vmem:[%s4400_s5] sm:$0xff]  ;;  %v899_v49 = vld [vmem:[%s4400_s5 + $0x8] sm:$0xff]  ;;  %p3156_p13 = pneg %p3155_p12 }
  0x48   : > { %v2753_v55 = vpack.c.bf16 %v426_v48, %v414_v47  ;;  %2750 = vmatprep.subr.bf16.mxu0 %v2749_v51  ;;  %v3495_v61 = vand.u32 4294901760, %v289_v58  ;;  %v2741_v62 = vpack.c.bf16 %v295_v6, %v291_v5  ;;  %v2757_v63 = vpack.c.bf16 %v3425_v17, %v3422_v16  ;;  %v1019_v51 = vld [vmem:[%s4398_s3] sm:$0xff] }
  0x49   : > { %2752 = vmatpush1.bf16.msra.mxu0 %v2751_v54  ;;  %v2755_v59 = vpack.c.bf16 %v432_v56, %v420_v52  ;;  %v365_v60 = vsub.f32 %v286_v53, %v3491_v57  ;;  %v2743_v2 = vpack.c.bf16 %v297_v11, %v293_v8  ;;  %v2745_v4 = vpack.c.bf16 %v303_v13, %v299_v12 }
  0x4a   : > { %2754 = vmatprep.subr.bf16.mxu0 %v2753_v55  ;;  %v376_v3 = vsub.f32 %v289_v58, %v3495_v61  ;;  %2742 = vmatprep.subr.bf16.mxu1 %v2741_v62  ;;  %v2759_v9 = vpack.c.bf16 %v3437_v21, %v3428_v18  ;;  %v2761_v5 = vpack.c.bf16 %v3442_v23, %v3440_v22  ;;  %v906_v38 = vlaneseq }
  0x4b   : > { %v366_v7 = vand.u32 4294901760, %v365_v60  ;;  %2744 = vmatpush1.bf16.msra.mxu1 %v2743_v2  ;;  %v2747_v6 = vpack.c.bf16 %v305_v24, %v301_v19  ;;  %v2763_v11 = vpack.c.bf16 %v3456_v32, %v3450_v28  ;;  %v2773_v13 = vpack.c.bf16 %v400_v26, %v388_v25 }
  0x4c   : > { %v377_v10 = vand.u32 4294901760, %v376_v3  ;;  %2746 = vmatprep.subr.bf16.mxu1 %v2745_v4  ;;  %v2775_v19 = vpack.c.bf16 %v406_v29, %v394_v27  ;;  %v2777_v24 = vpack.c.bf16 %v424_v31, %v412_v30  ;;  %v2779_v16 = vpack.c.bf16 %v430_v40, %v418_v36 }
  0x4d   : > { %2756 = vmatpush1.bf16.msra.mxu0 %v2755_v59  ;;  %v367_v14 = vsub.f32 %v365_v60, %v366_v7  ;;  %v3566_v39 = vshrl.u32 %v906_v38, 7  ;;  %v3568_v42 = vand.u32 127, %v906_v38  ;;  %v3231_v44 = vmov 2  }
  0x4e   : > { %2758 = vmatprep.subr.bf16.mxu0 %v2757_v63  ;;  %v378_v8 = vsub.f32 %v376_v3, %v377_v10  ;;  %3089 = vset.pattern.permute.xlu1 %v3231_v44  ;;  %vm1024_vm1 = vcmask 588800  }
  0x4f   : > { %v368_v15 = vand.u32 4294901760, %v367_v14  ;;  %2748 = vmatpush1.bf16.msra.mxu1 %v2747_v6  ;;  %v3571_v43 = vsub.s32 1, %v3566_v39  ;;  %v3577_v48 = vsub.s32 0, %v3566_v39  ;;  %v1001_v50 = vsub.s32 7, %v3566_v39 }
  0x50   : > { %492 = vmatmul.mubr.f32.vlgmr.msra.gmra.mrb[0].mxu0 %v3491_v57  ;;  %v379_v12 = vand.u32 4294901760, %v378_v8  ;;  %vm908_vm2 = vcmp.lt.s32.totalorder %v3568_v42, 68  ;;  %vm925_vm3 = vcmp.lt.s32.totalorder %v3568_v42, 64  ;;  %v947_v53 = vsub.s32 2, %v3566_v39 }
  0x51   : > { %2760 = vmatpush1.bf16.msra.mxu0 %v2759_v9  ;;  %497 = vmatprep.mubr.f32.mxu0 %v4404_v0  ;;  %4439 = vst [vmem:[#allocation8_spill] sm:$0xff] %v3571_v43  ;;  %4440 = vst [vmem:[#allocation9_spill] sm:$0xff] %v3577_v48  ;;  %v3590_v52 = vrot.slane %v898_v46, %v3571_v43  ;;  %v3594_v54 = vrot.slane %v899_v49, %v3571_v43  ;;  %v1026_v59 = vsel %vm1024_vm1, %v1019_v51, 0 }
  0x52   : > { %2762 = vmatprep.subr.bf16.mxu0 %v2761_v5  ;;  %369 = vmatmul.mubr.f32.vlgmr.msra.gmra.mrb[0].mxu1 %v368_v15  ;;  %v3597_v56 = vrot.slane %v898_v46, %v3577_v48  ;;  %vm942_vm4 = vcmp.lt.s32.totalorder %v3568_v42, 60  ;;  %v3622_v9 = vrot.slane %v898_v46, %v947_v53  ;;  %v3625_v14 = vand.u32 4294901760, %v1026_v59 }
  0x53   : > { %374 = vmatprep.mubr.f32.mxu1 %v4404_v0  ;;  %v3627_v5 = vrot.slane %v899_v49, %v947_v53  ;;  %vm959_vm5 = vcmp.lt.s32.totalorder %v3568_v42, 4  ;;  %vm976_vm6 = vcmp.lt.s32.totalorder %v3568_v42, 124 }
  0x54   : > { %499 = vmatmul.mubr.f32.gmra.mrb[2].mxu0 %v3495_v61  ;;  %4442 = vst [vmem:[#allocation11_spill] sm:$0xff] %v3622_v9 }
  0x55   : > { %2764 = vmatpush1.bf16.msra.mxu0 %v2763_v11  ;;  %585 = vmatprep.mubr.f32.mxu0 %v4404_v0  ;;  %4443 = vst [vmem:[#allocation12_spill] sm:$0xff] %v3627_v5 }
  0x56   : > { %2766 = vmatprep.subr.bf16.mxu0 %v2741_v62  ;;  %380 = vmatmul.mubr.f32.gmra.mrb[2].mxu1 %v379_v12  ;;  %v981_v12 = vsub.s32 5, %v3566_v39 }
  0x57   : > { %1110 = vmatprep.mubr.f32.mxu1 %v4404_v0 }
  0x58   : > { %588 = vmatmul.mubr.f32.vlgmr.msra.gmra.mrb[0].mxu0 %v365_v60  ;;  %v3603_v60 = vrot.slane %v898_v46, %v1001_v50 }
  0x59   : > { %2768 = vmatpush1.bf16.msra.mxu0 %v2743_v2  ;;  %593 = vmatprep.mubr.f32.mxu0 %v4404_v0 }
  0x5a   : > { %2770 = vmatprep.subr.bf16.mxu0 %v2745_v4 }
  0x5c   : > { %596 = vmatmul.mubr.f32.gmra.mrb[2].mxu0 %v376_v3 }
  0x5d   : > { %2772 = vmatpush1.bf16.msra.mxu0 %v2747_v6  ;;  %674 = vmatprep.mubr.f32.mxu0 %v4404_v0 }
  0x5e   : > { %2774 = vmatprep.subr.bf16.mxu0 %v2773_v13 }
  0x60   : > { %678 = vmatmul.mubr.f32.vlgmr.msra.gmra.mrb[0].mxu0 %v366_v7 }
  0x61   : > { %2776 = vmatpush1.bf16.msra.mxu0 %v2775_v19  ;;  %683 = vmatprep.mubr.f32.mxu0 %v4404_v0 }
  0x62   : > { %2778 = vmatprep.subr.bf16.mxu0 %v2777_v24 }
  0x64   : > { %687 = vmatmul.mubr.f32.gmra.mrb[2].mxu0 %v377_v10  ;;  %v964_v10 = vsub.s32 3, %v3566_v39 }
  0x65   : > { %2780 = vmatpush1.bf16.msra.mxu0 %v2779_v16  ;;  %781 = vmatprep.mubr.f32.mxu0 %v4404_v0 }
  0x66   : > { %2782 = vmatprep.subr.bf16.mxu0 %v2741_v62 }
  0x68   : > { %783 = vmatmul.mubr.f32.vlgmr.msra.gmra.mrb[0].mxu0 %v3491_v57 }
  0x69   : > { %2784 = vmatpush1.bf16.msra.mxu0 %v2743_v2  ;;  %788 = vmatprep.mubr.f32.mxu0 %v4404_v0  ;;  %v3612_v2 = vrot.slane %v899_v49, %v1001_v50 }
  0x6a   : > { %2786 = vmatprep.subr.bf16.mxu0 %v2745_v4 }
  0x6b   : > { %4441 = vst [vmem:[#allocation10_spill] sm:$0xff] %v3612_v2 }
  0x6c   : > { %790 = vmatmul.mubr.f32.gmra.mrb[2].mxu0 %v3495_v61 }
  0x6d   : > { %2788 = vmatpush1.bf16.msra.mxu0 %v2747_v6  ;;  %868 = vmatprep.mubr.f32.mxu0 %v4404_v0 }
  0x70   : > { %870 = vmatmul.mubr.f32.vlgmr.msra.gmra.mrb[0].mxu0 %v3491_v57  ;;  %v3600_v57 = vrot.slane %v899_v49, %v3577_v48 }
  0x71   : > { %875 = vmatprep.mubr.f32.mxu0 %v4404_v0 }
  0x74   : > { %877 = vmatmul.mubr.f32.gmra.mrb[2].mxu0 %v3495_v61  ;;  %v991_v61 = vsub.s32 6, %v3566_v39 }
  0x75   : > { %2006 = vmatprep.mubr.f32.mxu0 %v4404_v0 }
  0x76   : > { %v3638_v24 = vrot.slane %v898_v46, %v991_v61 }
  0xbe   : > { %v892_v25 = vpop.permute.xlu0 %891 }
 0x125   : > { %v370_v17 = vpop.f32.mrb[0].mxu1 }
 0x126   : > { %v372_v18 = vpop.f32.mrb[1].mxu1 }
 0x129   : > { %v381_v21 = vpop.f32.mrb[2].mxu1 }
 0x12a   : > { %v383_v22 = vpop.f32.mrb[3].mxu1 }
 0x143   : > { %v871_v23 = vpop.f32.mrb[0].mxu0 }
 0x144   : > { %v2981_v26 = vadd.f32 %v871_v23, %v370_v17  ;;  %v873_v27 = vpop.f32.mrb[1].mxu0  ;;  %v3655_v23 = vrot.slane %v899_v49, %v964_v10 }
 0x145   : > { %v2982_v28 = vadd.f32 %v873_v27, %v372_v18 }
 0x146   : > { %v894_v29 = vadd.f32 %v2981_v26, %v892_v25  ;;  %4445 = vst [vmem:[#allocation14_spill] sm:$0xff] %v3655_v23 }
 0x147   : > { %v878_v30 = vpop.f32.mrb[2].mxu0  ;;  %v895_v31 = vadd.f32 %v2982_v28, %v892_v25  ;;  %v3659_v25 = vsub.f32 %v1026_v59, %v3625_v14 }
 0x148   : > { %v3540_v32 = vmax.f32 %v894_v29, 0.0  ;;  %v2983_v33 = vadd.f32 %v878_v30, %v381_v21  ;;  %v880_v34 = vpop.f32.mrb[3].mxu0  ;;  %v3663_v29 = vrot.slane %v898_v46, %v981_v12 }
 0x149   : > { %v2984_v35 = vadd.f32 %v880_v34, %v383_v22  ;;  %v3548_v37 = vmax.f32 %v895_v31, 0.0  ;;  %v3653_v22 = vrot.slane %v898_v46, %v964_v10 }
 0x14a   : > { %921 = vrot.lane.b32.xlu1 %v3540_v32, %s3226_s14  ;;  %902 = vrot.lane.b32.xlu0 %v3540_v32, %s3227_s15  ;;  %v1046_v4 = vand.u32 4294901760, %v3540_v32  ;;  %4446 = vst [vmem:[#allocation15_spill] sm:$0xff] %v3663_v29 }
 0x14b   : > { %v3546_v36 = vadd.f32 %v2984_v35, %v2983_v33  ;;  %v1044_v16 = vand.u32 4294901760, %v3548_v37  ;;  %4444 = vst [vmem:[#allocation13_spill] sm:$0xff] %v3653_v22 }
 0x14c   : > { %v3651_v21 = vsub.f32 %v3540_v32, %v1046_v4 }
 0x14d   : > { %v3676_v44 = vsub.f32 %v3548_v37, %v1044_v16 }
 0x14e   : > { %938 = vrot.lane.b32.xlu1 %v3540_v32, %s3228_s17  ;;  %923 = vrot.lane.b32.xlu0 %v3548_v37, %s3226_s14 }
 0x152   : > { %940 = vrot.lane.b32.xlu0 %v3548_v37, %s3228_s17  ;;  %904 = vrot.lane.b32.xlu1 %v3548_v37, %s3227_s15 }
 0x156   : > { %957 = vrot.lane.b32.xlu0 %v3548_v37, %s3229_s26  ;;  %955 = vrot.lane.b32.xlu1 %v3540_v32, %s3229_s26 }
 0x15a   : > { %974 = vrot.lane.b32.xlu0 %v3548_v37, %s3230_s28  ;;  %972 = vrot.lane.b32.xlu1 %v3540_v32, %s3230_s28 }
 0x15e   : > { %1021 = vperm.xlu1 %3089, %v3434_v20  }
 0x1bc   : > { %v922_v40 = vpop.permute.xlu1 %921  ;;  %v903_v41 = vpop.permute.xlu0 %902 }
 0x1c0   : > { %v939_v45 = vpop.permute.xlu1 %938  ;;  %v924_v47 = vpop.permute.xlu0 %923 }
 0x1c1   : > { %v927_v3 = vsel %vm925_vm3, %v924_v47, %v922_v40  ;;  %v3620_v7 = vsel %vm925_vm3, %v922_v40, %v924_v47  ;;  %v3671_v40 = vrot.slane %v899_v49, %v991_v61  ;;  %v4406_v47 = vand.u32 4294901760, %v3659_v25 }
 0x1c2   : > { %v936_v13 = vmul.f32 %v3590_v52, %v927_v3  ;;  %v937_v17 = vmul.f32 %v3594_v54, %v3620_v7 }
 0x1c4   : > { %v941_v55 = vpop.permute.xlu0 %940  ;;  %v905_v58 = vpop.permute.xlu1 %904  ;;  %v1034_v30 = vand.u32 4294901760, %v936_v13  ;;  %v1032_v39 = vand.u32 4294901760, %v937_v17 }
 0x1c5   : > { %v3608_v62 = vsel %vm908_vm2, %v903_v41, %v905_v58  ;;  %v910_v63 = vsel %vm908_vm2, %v905_v58, %v903_v41  ;;  %v3636_v19 = vsel %vm942_vm4, %v939_v45, %v941_v55  ;;  %v3645_v18 = vsel %vm942_vm4, %v941_v55, %v939_v45 }
 0x1c6   : > { %v919_v6 = vmul.f32 %v3597_v56, %v910_v63  ;;  %v920_v15 = vmul.f32 %v3600_v57, %v3608_v62  ;;  %v954_v26 = vmul.f32 %v3627_v5, %v3636_v19  ;;  %v953_v31 = vmul.f32 %v3622_v9, %v3645_v18 }
 0x1c7   : > { %v3673_v41 = vrot.slane %v899_v49, %v981_v12  ;;  %v998_v10 = vmul.f32 %v3671_v40, %v910_v63 }
 0x1c8   : > { %v958_v8 = vpop.permute.xlu0 %957  ;;  %v956_v11 = vpop.permute.xlu1 %955  ;;  %v1028_v27 = vand.u32 4294901760, %v920_v15  ;;  %v1030_v28 = vand.u32 4294901760, %v919_v6  ;;  %v1036_v51 = vand.u32 4294901760, %v954_v26  ;;  %v1038_v58 = vand.u32 4294901760, %v953_v31 }
 0x1c9   : > { %v960_v33 = vsel %vm959_vm5, %v956_v11, %v958_v8  ;;  %v961_v34 = vsel %vm959_vm5, %v958_v8, %v956_v11  ;;  %4447 = vst [vmem:[#allocation16_spill] sm:$0xff] %v3673_v41 }
 0x1ca   : > { %v3678_v45 = vpack.c.bf16 %v1034_v30, %v1030_v28  ;;  %v970_v46 = vmul.f32 %v3653_v22, %v961_v34  ;;  %v971_v53 = vmul.f32 %v3655_v23, %v960_v33  ;;  %v3684_v55 = vpack.c.bf16 %v1032_v39, %v1028_v27 }
 0x1cb   : > { %v3692_v8 = vsub.f32 %v920_v15, %v1028_v27  ;;  %v1008_v33 = vmul.f32 %v3612_v2, %v927_v3  ;;  %v3697_v34 = vsub.f32 %v919_v6, %v1030_v28  ;;  %v3708_v27 = vsub.f32 %v936_v13, %v1034_v30 }
 0x1cc   : > { %v975_v35 = vpop.permute.xlu0 %974  ;;  %v973_v38 = vpop.permute.xlu1 %972  ;;  %v1042_v59 = vand.u32 4294901760, %v970_v46  ;;  %v1040_v11 = vand.u32 4294901760, %v971_v53  ;;  %2790 = vmatprep.subr.bf16.mxu1 %v3684_v55  ;;  %v3715_v3 = vsub.f32 %v3659_v25, %v4406_v47  ;;  %v3718_v28 = vsub.f32 %v954_v26, %v1036_v51 }
 0x1cd   : > { %v977_v49 = vsel %vm976_vm6, %v973_v38, %v975_v35  ;;  %v978_v37 = vsel %vm976_vm6, %v975_v35, %v973_v38  ;;  %2792 = vmatpush1.bf16.msra.mxu1 %v3678_v45  ;;  %v3702_v35 = vsub.f32 %v937_v17, %v1032_v39  ;;  %v1052_v17 = vand.u32 4294901760, %v998_v10 }
 0x1ce   : > { %v987_v61 = vmul.f32 %v3663_v29, %v977_v49  ;;  %v988_v12 = vmul.f32 %v3673_v41, %v978_v37  ;;  %v3699_v1 = vpack.c.bf16 %v1042_v59, %v1038_v58  ;;  %v3704_v38 = vsub.f32 %v971_v53, %v1040_v11 }
 0x1cf   : > { %v3706_v15 = vpack.c.bf16 %v1040_v11, %v1036_v51  ;;  %v997_v49 = vmul.f32 %v3638_v24, %v3608_v62  ;;  %v4407_v13 = vand.u32 4294901760, %v3692_v8  ;;  %v1007_v30 = vmul.f32 %v3603_v60, %v3620_v7  ;;  %v3729_v62 = vld [vmem:[%s4400_s5 + $0x18] ss:$0 sm:$0xff] }
 0x1d0   : > { %v1050_v0 = vand.u32 4294901760, %v987_v61  ;;  %v1048_v63 = vand.u32 4294901760, %v988_v12  ;;  %4448 = vst [vmem:[#allocation17_spill] sm:$0xff] %v3729_v62  ;;  %v4408_v53 = vand.u32 4294901760, %v3697_v34  ;;  %v3732_v37 = vsub.f32 %v970_v46, %v1042_v59 }
 0x1d1   : > { %2794 = vmatprep.subr.bf16.mxu1 %v3706_v15  ;;  %v4411_v7 = vand.u32 4294901760, %v3702_v35  ;;  %v4414_v11 = vand.u32 4294901760, %v3704_v38  ;;  %v3745_v50 = vsub.f32 %v953_v31, %v1038_v58  ;;  %v1054_v46 = vand.u32 4294901760, %v997_v49 }
 0x1d2   : > { %v3721_v39 = vpack.c.bf16 %v1048_v63, %v1044_v16  ;;  %v3736_v26 = vpack.c.bf16 %v1050_v0, %v1046_v4  ;;  %2796 = vmatpush1.bf16.msra.mxu1 %v3699_v1  ;;  %v1056_v16 = vand.u32 4294901760, %v1008_v33  ;;  %v3739_v51 = vsub.f32 %v988_v12, %v1048_v63  ;;  %v3751_v4 = vld [vmem:[%s4400_s5 + $0x10] ss:$0 sm:$0xff] }
 0x1d3   : > { %v1115_v32 = vand.u32 4294901760, %v3715_v3  ;;  %4449 = vst [vmem:[#allocation18_spill] sm:$0xff] %v3751_v4  ;;  %v1018_v59 = vmul.f32 %v3729_v62, %v3645_v18  ;;  %v1125_v63 = vsub.f32 %v3692_v8, %v4407_v13  ;;  %v1058_v58 = vand.u32 4294901760, %v1007_v30 }
 0x1d4   : > { %2798 = vmatprep.subr.bf16.mxu1 %v3721_v39  ;;  %v3755_v12 = vpack.c.bf16 %v1056_v16, %v1052_v17  ;;  %v1131_v3 = vsub.f32 %v3697_v34, %v4408_v53  ;;  %v3765_v47 = vsub.f32 %v987_v61, %v1050_v0  ;;  %v3768_v18 = vsub.f32 %v998_v10, %v1052_v17 }
 0x1d5   : > { %v1137_v13 = vsub.f32 %v3702_v35, %v4411_v7  ;;  %v1161_v31 = vsub.f32 %v3704_v38, %v4414_v11  ;;  %v4450_v6 = vand.u32 4294901760, %v3708_v27  ;;  %v1017_v61 = vmul.f32 %v3751_v4, %v3636_v19 }
 0x1d6   : > { %2800 = vmatpush1.bf16.msra.mxu1 %v3736_v26  ;;  %v3784_v17 = vpack.c.bf16 %v1058_v58, %v1054_v46  ;;  %v3786_v43 = vsub.f32 %v1008_v33, %v1056_v16  ;;  %v3788_v7 = vand.u32 4294901760, %v1018_v59  ;;  %v1126_v48 = vand.u32 4294901760, %v1125_v63 }
 0x1d7   : > { %2802 = vmatprep.subr.bf16.mxu1 %v3755_v12  ;;  %v1143_v0 = vsub.f32 %v3708_v27, %v4450_v6  ;;  %v4451_v11 = vand.u32 4294901760, %v3718_v28  ;;  %v3793_v41 = vsub.f32 %v997_v49, %v1054_v46  ;;  %v4452_v6 = vand.u32 4294901760, %v3732_v37 }
 0x1d8   : > { %v1132_v10 = vand.u32 4294901760, %v1131_v3  ;;  %v1138_v33 = vand.u32 4294901760, %v1137_v13  ;;  %v1162_v16 = vand.u32 4294901760, %v1161_v31  ;;  %v4453_v63 = vand.u32 4294901760, %v3739_v51 }
 0x1d9   : > { %v1149_v53 = vsub.f32 %v3718_v28, %v4451_v11  ;;  %v1167_v29 = vsub.f32 %v3732_v37, %v4452_v6  ;;  %v3805_v11 = vsub.f32 %v1007_v30, %v1058_v58  ;;  %v3807_v46 = vand.u32 4294901760, %v1017_v61 }
 0x1da   : > { %2804 = vmatpush1.bf16.msra.mxu1 %v3784_v17  ;;  %v1185_v4 = vsub.f32 %v3739_v51, %v4453_v63  ;;  %v4454_v6 = vand.u32 4294901760, %v3745_v50  ;;  %v1144_v62 = vand.u32 4294901760, %v1143_v0  ;;  %v2805_v3 = vpack.c.bf16 %v1138_v33, %v1126_v48 }
 0x1db   : > { %1061 = vmatprep.subr.mxu1 %v3788_v7  ;;  %v1150_v23 = vand.u32 4294901760, %v1149_v53  ;;  %v4455_v13 = vand.u32 4294901760, %v3676_v44  ;;  %v4422_v22 = vand.u32 4294901760, %v3786_v43  ;;  %v4456_v30 = vand.u32 4294901760, %v3765_v47 }
 0x1dc   : > { %v1155_v19 = vsub.f32 %v3745_v50, %v4454_v6  ;;  %v2807_v49 = vpack.c.bf16 %v1144_v62, %v1132_v10  ;;  %v1168_v5 = vand.u32 4294901760, %v1167_v29  ;;  %v3822_v0 = vsub.f32 %v1018_v59, %v3788_v7 }
 0x1dd   : > { %v1173_v31 = vsub.f32 %v3676_v44, %v4455_v13  ;;  %v1191_v58 = vsub.f32 %v3765_v47, %v4456_v30  ;;  %v2809_v48 = vpack.c.bf16 %v1162_v16, %v1150_v23  ;;  %v1186_v53 = vand.u32 4294901760, %v1185_v4 }
 0x1de   : > { %1063 = vmatpush1.msra.mxu1 %v3807_v46  ;;  %v4457_v33 = vand.u32 4294901760, %v3768_v18  ;;  %v1214_v13 = vand.u32 4294901760, %v3805_v11  ;;  %v1156_v63 = vand.u32 4294901760, %v1155_v19  ;;  %v4458_v30 = vand.u32 4294901760, %v3651_v21 }
 0x1df   : > { %2806 = vmatprep.subr.bf16.mxu1 %v2805_v3  ;;  %1116 = vmatmul.mubr.f32.vlgmr.msra.gmra.mrb[4].mxu1 %v1115_v32  ;;  %v4459_v29 = vmov 0.0   ;;  %v1174_v59 = vand.u32 4294901760, %v1173_v31  ;;  %v1209_v23 = vsub.f32 %v3786_v43, %v4422_v22  ;;  %v3836_v32 = vsub.f32 %v1017_v61, %v3807_v46 }
 0x1e0   : > { %v1197_v6 = vsub.f32 %v3768_v18, %v4457_v33  ;;  %2808 = vmatpush1.bf16.msra.mxu1 %v2807_v49  ;;  %v1179_v62 = vsub.f32 %v3651_v21, %v4458_v30  ;;  %1276 = vmatprep.mubr.f32.mxu1 %v4459_v29  ;;  %v4460_v4 = vand.u32 4294901760, %v3793_v41  ;;  %v2811_v19 = vpack.c.bf16 %v1168_v5, %v1156_v63 }
 0x1e1   : > { %2810 = vmatprep.subr.bf16.mxu1 %v2809_v48  ;;  %v1192_v16 = vand.u32 4294901760, %v1191_v58  ;;  %v2813_v49 = vpack.c.bf16 %v1186_v53, %v1174_v59  ;;  %v1220_v33 = vand.u32 4294901760, %v3822_v0  ;;  %v1215_v31 = vsub.f32 %v3805_v11, %v1214_v13 }
 0x1e2   : > { %v1203_v10 = vsub.f32 %v3793_v41, %v4460_v4  ;;  %v1198_v3 = vand.u32 4294901760, %v1197_v6  ;;  %v1180_v48 = vand.u32 4294901760, %v1179_v62  ;;  %v1210_v30 = vand.u32 4294901760, %v1209_v23 }
 0x1e3   : > { %v1226_v61 = vand.u32 4294901760, %v3836_v32  ;;  %v1221_v5 = vsub.f32 %v3822_v0, %v1220_v33  ;;  %v1216_v63 = vand.u32 4294901760, %v1215_v31  ;;  %v2821_v59 = vpack.c.bf16 %v3702_v35, %v3692_v8 }
 0x1e4   : > { %2812 = vmatpush1.bf16.msra.mxu1 %v2811_v19  ;;  %v2815_v22 = vpack.c.bf16 %v1192_v16, %v1180_v48  ;;  %v1204_v9 = vand.u32 4294901760, %v1203_v10  ;;  %v2817_v2 = vpack.c.bf16 %v1210_v30, %v1198_v3  ;;  %v2823_v23 = vpack.c.bf16 %v3708_v27, %v3697_v34 }
 0x1e5   : > { %2814 = vmatprep.subr.bf16.mxu1 %v2813_v49  ;;  %v1227_v53 = vsub.f32 %v3836_v32, %v1226_v61  ;;  %v1222_v6 = vand.u32 4294901760, %v1221_v5  ;;  %v2831_v4 = vpack.c.bf16 %v3765_v47, %v3651_v21  ;;  %v2833_v10 = vpack.c.bf16 %v3786_v43, %v3768_v18 }
 0x1e6   : > { %v2819_v58 = vpack.c.bf16 %v1216_v63, %v1204_v9  ;;  %v2827_v9 = vpack.c.bf16 %v3732_v37, %v3745_v50  ;;  %v2835_v19 = vpack.c.bf16 %v3805_v11, %v3793_v41  ;;  %v4461_v16 = vand.u32 4294901760, %v3692_v8 }
 0x1e7   : > { %v1228_v62 = vand.u32 4294901760, %v1227_v53  ;;  %v4462_v49 = vand.u32 4294901760, %v3702_v35  ;;  %v4463_v31 = vand.u32 4294901760, %v3697_v34  ;;  %v4464_v48 = vand.u32 4294901760, %v3708_v27 }
 0x1e8   : > { %2816 = vmatpush1.bf16.msra.mxu1 %v2815_v22  ;;  %v2829_v22 = vpack.c.bf16 %v3739_v51, %v3676_v44  ;;  %v4465_v5 = vand.u32 4294901760, %v3659_v25  ;;  %v4466_v63 = vand.u32 4294901760, %v3718_v28  ;;  %v4468_v8 = vand.u32 4294901760, %v3745_v50 }
 0x1e9   : > { %2818 = vmatprep.subr.bf16.mxu1 %v2817_v2  ;;  %v2825_v2 = vpack.c.bf16 %v3704_v38, %v3718_v28  ;;  %v2853_v3 = vpack.c.bf16 %v4462_v49, %v4461_v16  ;;  %v2855_v30 = vpack.c.bf16 %v4464_v48, %v4463_v31  ;;  %v4469_v34 = vand.u32 4294901760, %v3732_v37 }
 0x1ea   : > { %v4470_v27 = vand.u32 4294901760, %v3676_v44  ;;  %v4472_v28 = vand.u32 4294901760, %v3651_v21  ;;  %v4476_v37 = vand.u32 4294901760, %v3793_v41 }
 0x1eb   : > { %v2859_v35 = vpack.c.bf16 %v4469_v34, %v4468_v8 }
 0x1ec   : > { %2820 = vmatpush1.bf16.msra.mxu1 %v2819_v58  ;;  %v4467_v58 = vand.u32 4294901760, %v3704_v38  ;;  %v4473_v38 = vand.u32 4294901760, %v3765_v47  ;;  %v2867_v44 = vpack.c.bf16 %v1214_v13, %v4476_v37 }
 0x1ed   : > { %1223 = vmatprep.subr.mxu1 %v1222_v6  ;;  %v4471_v6 = vand.u32 4294901760, %v3739_v51  ;;  %v3976_v51 = vld [vmem:[%s4397_s2 + $0x18] sm:$0xff] }
 0x1ee   : > { %v2857_v53 = vpack.c.bf16 %v4467_v58, %v4466_v63 }
 0x1f0   : > { %1229 = vmatpush1.msra.mxu1 %v1228_v62  ;;  %v2863_v62 = vpack.c.bf16 %v4473_v38, %v4472_v28 }
 0x1f1   : > { %2822 = vmatprep.subr.bf16.mxu1 %v2821_v59  ;;  %1278 = vmatmul.mubr.f32.vlgmr.msra.gmra.mrb[4].mxu1 %v3625_v14  ;;  %v4474_v59 = vand.u32 4294901760, %v3768_v18 }
 0x1f2   : > { %2824 = vmatpush1.bf16.msra.mxu1 %v2823_v23  ;;  %1384 = vmatprep.mubr.f32.mxu1 %v4459_v29  ;;  %v4475_v23 = vand.u32 4294901760, %v3786_v43  ;;  %v1022_v43 = vpop.permute.xlu1 %1021 }
 0x1f3   : > { %2826 = vmatprep.subr.bf16.mxu1 %v2825_v2 }
 0x1f4   : > { %v2865_v50 = vpack.c.bf16 %v4475_v23, %v4474_v59 }
 0x1f6   : > { %2828 = vmatpush1.bf16.msra.mxu1 %v2827_v9 }
 0x1f7   : > { %2830 = vmatprep.subr.bf16.mxu1 %v2829_v22 }
 0x1fa   : > { %2832 = vmatpush1.bf16.msra.mxu1 %v2831_v4 }
 0x1fb   : > { %2834 = vmatprep.subr.bf16.mxu1 %v2833_v10 }
 0x1fe   : > { %2836 = vmatpush1.bf16.msra.mxu1 %v2835_v19 }
 0x1ff   : > { %1334 = vmatprep.subr.mxu1 %v3822_v0 }
 0x202   : > { %1337 = vmatpush1.msra.mxu1 %v3836_v32 }
 0x203   : > { %2838 = vmatprep.subr.bf16.mxu1 %v3684_v55  ;;  %1387 = vmatmul.mubr.f32.vlgmr.msra.gmra.mrb[4].mxu1 %v3659_v25  ;;  %v2861_v25 = vpack.c.bf16 %v4471_v6, %v4470_v27 }
 0x204   : > { %2840 = vmatpush1.bf16.msra.mxu1 %v3678_v45  ;;  %1475 = vmatprep.mubr.f32.mxu1 %v4459_v29 }
 0x205   : > { %2842 = vmatprep.subr.bf16.mxu1 %v3706_v15 }
 0x208   : > { %2844 = vmatpush1.bf16.msra.mxu1 %v3699_v1 }
 0x209   : > { %2846 = vmatprep.subr.bf16.mxu1 %v3721_v39 }
 0x20c   : > { %2848 = vmatpush1.bf16.msra.mxu1 %v3736_v26 }
 0x20d   : > { %2850 = vmatprep.subr.bf16.mxu1 %v3755_v12 }
 0x210   : > { %2852 = vmatpush1.bf16.msra.mxu1 %v3784_v17 }
 0x211   : > { %1426 = vmatprep.subr.mxu1 %v3788_v7 }
 0x214   : > { %1428 = vmatpush1.msra.mxu1 %v3807_v46 }
 0x215   : > { %2854 = vmatprep.subr.bf16.mxu1 %v2853_v3  ;;  %1479 = vmatmul.mubr.f32.vlgmr.msra.gmra.mrb[4].mxu1 %v4465_v5 }
 0x216   : > { %2856 = vmatpush1.bf16.msra.mxu1 %v2855_v30  ;;  %1603 = vmatprep.mubr.f32.mxu1 %v4459_v29 }
 0x217   : > { %2858 = vmatprep.subr.bf16.mxu1 %v2857_v53  ;;  %v4477_v53 = vld [vmem:[#allocation10_spill] sm:$0xff] }
 0x21a   : > { %2860 = vmatpush1.bf16.msra.mxu1 %v2859_v35 }
 0x21b   : > { %2862 = vmatprep.subr.bf16.mxu1 %v2861_v25 }
 0x21e   : > { %2864 = vmatpush1.bf16.msra.mxu1 %v2863_v62 }
 0x21f   : > { %2866 = vmatprep.subr.bf16.mxu1 %v2865_v50 }
 0x222   : > { %2868 = vmatpush1.bf16.msra.mxu1 %v2867_v44 }
 0x223   : > { %1552 = vmatprep.subr.mxu1 %v1220_v33 }
 0x226   : > { %1556 = vmatpush1.msra.mxu1 %v1226_v61 }
 0x227   : > { %2870 = vmatprep.subr.bf16.mxu1 %v3684_v55  ;;  %1605 = vmatmul.mubr.f32.vlgmr.msra.gmra.mrb[4].mxu1 %v3625_v14 }
 0x228   : > { %2872 = vmatpush1.bf16.msra.mxu1 %v3678_v45  ;;  %1693 = vmatprep.mubr.f32.mxu1 %v4459_v29 }
 0x229   : > { %2874 = vmatprep.subr.bf16.mxu1 %v3706_v15  ;;  %v3233_v15 = vmov 4  }
 0x22c   : > { %2876 = vmatpush1.bf16.msra.mxu1 %v3699_v1 }
 0x22d   : > { %2878 = vmatprep.subr.bf16.mxu1 %v3721_v39  ;;  %v3967_v39 = vld [vmem:[%s4397_s2] sm:$0xff] }
 0x230   : > { %2880 = vmatpush1.bf16.msra.mxu1 %v3736_v26  ;;  %v3234_v26 = vmov 6  }
 0x231   : > { %2882 = vmatprep.subr.bf16.mxu1 %v3755_v12 }
 0x234   : > { %2884 = vmatpush1.bf16.msra.mxu1 %v3784_v17 }
 0x235   : > { %1644 = vmatprep.subr.mxu1 %v3788_v7 }
 0x238   : > { %1646 = vmatpush1.msra.mxu1 %v3807_v46 }
 0x239   : > { %1695 = vmatmul.mubr.f32.vlgmr.msra.gmra.mrb[4].mxu1 %v3625_v14  ;;  %v3232_v14 = vmov 3  }
 0x23a   : > { %1840 = vmatprep.mubr.f32.mxu1 %v4459_v29  ;;  %3090 = vset.pattern.permute.xlu1 %v3232_v14 }
 0x30c   : > { %v1696_v21 = vpop.f32.mrb[4].mxu1 }
 0x30d   : > { %v2985_v41 = vadd.f32 %v1696_v21, %v1022_v43  ;;  %v1698_v1 = vpop.f32.mrb[5].mxu1 }
 0x30e   : > { %v2986_v45 = vadd.f32 %v1698_v1, %v1022_v43  ;;  %v4478_v43 = vld [vmem:[#allocation11_spill] sm:$0xff] }
 0x30f   : > { %v3937_v47 = vmax.f32 %v2985_v41, 0.0  ;;  %v4479_v41 = vld [vmem:[#allocation12_spill] sm:$0xff] }
 0x310   : > { %v3939_v55 = vmax.f32 %v2986_v45, 0.0 }
 0x311   : > { %1703 = vrot.lane.b32.xlu0 %v3937_v47, %s3227_s15  ;;  %v1776_v12 = vand.u32 4294901760, %v3937_v47 }
 0x312   : > { %1705 = vrot.lane.b32.xlu1 %v3939_v55, %s3227_s15  ;;  %v1774_v7 = vand.u32 4294901760, %v3939_v55 }
 0x313   : > { %v3993_v0 = vsub.f32 %v3937_v47, %v1776_v12 }
 0x314   : > { %v3987_v17 = vsub.f32 %v3939_v55, %v1774_v7 }
 0x315   : > { %1711 = vrot.lane.b32.xlu0 %v3937_v47, %s3226_s14  ;;  %v4426_v19 = vand.u32 4294901760, %v3993_v0 }
 0x316   : > { %1713 = vrot.lane.b32.xlu1 %v3939_v55, %s3226_s14  ;;  %v4428_v22 = vand.u32 4294901760, %v3987_v17  ;;  %s3237_s14 = smov [#allocation5]  }
 0x317   : > { %v4039_v27 = vsub.f32 %v3993_v0, %v4426_v19  ;;  %v4485_v19 = vld [vmem:[#allocation16_spill] sm:$0xff]  ;;  %s3157_s15 = sshll.u32 %s3237_s14, 4  ;;  %s3158_s15 = int_to_ptr.vmem [resolvable:$false] %s3157_s15 }
 0x318   : > { %p3160_p8 = scmp.lt.s32.totalorder %s4350_s11, %s3158_s15 }
 0x319   : > { %1719 = vrot.lane.b32.xlu0 %v3937_v47, %s3228_s17 }
 0x31a   : > { %1721 = vrot.lane.b32.xlu1 %v3939_v55, %s3228_s17  ;;  %s3159_s17 = scalar_lea.vmem %s3158_s15, 2048 }
 0x31b   : > { %p3161_p10 = scmp.lt.s32.totalorder %s3159_s17, %s3153_s16 }
 0x31d   : > { %1727 = vrot.lane.b32.xlu0 %v3937_v47, %s3229_s26  ;;  %p3162_p0 = por %p3161_p10, %p3160_p8 }
 0x31e   : > { %1729 = vrot.lane.b32.xlu1 %v3939_v55, %s3229_s26 }
 0x31f   : > { %p3163_p2 = pnand %p3162_p0, %p3156_p13 }
 0x321   : > { %1735 = vrot.lane.b32.xlu0 %v3937_v47, %s3230_s28 }
 0x322   : > { %1737 = vrot.lane.b32.xlu1 %v3939_v55, %s3230_s28 }
 0x326   : > { %1752 = vperm.xlu1 %3090, %v3434_v20  }
 0x32a   : > { %3091 = vset.pattern.permute.xlu1 %v3233_v15 }
 0x32b   : > { %2434 = vperm.xlu1 %3091, %v3434_v20  }
 0x32f   : > { %3092 = vset.pattern.permute.xlu1 %v3234_v26 }
 0x330   : > { %2452 = vperm.xlu1 %3092, %v3434_v20   ;;  %v2733_v20 = vld [vmem:[%s4398_s3 + $0x8] sm:$0xff] }
 0x331   : > { %v1756_v11 = vsel %vm1024_vm1, %v2733_v20, 0 }
 0x332   : > { %v4001_v2 = vand.u32 4294901760, %v1756_v11 }
 0x334   : > { %v4006_v16 = vsub.f32 %v1756_v11, %v4001_v2 }
 0x340   : > { %884 = vadd.xlane.f32.xlu0 %v3546_v36  ;;  %v4425_v36 = vmov 1  }
 0x341   : > { %3093 = vset.pattern.permute.xlu1 %v4425_v36 }
 0x356   : > { %2505 = vperm.xlu0 %3088, %v3967_v39  }
 0x35a   : > { %3097 = vset.pattern.permute.xlu0 %v4425_v36 }
 0x35b   : > { %2560 = vperm.xlu0 %3097, %v3976_v51  }
 0x383   : > { %v1704_v18 = vpop.permute.xlu0 %1703 }
 0x384   : > { %v1706_v46 = vpop.permute.xlu1 %1705 }
 0x385   : > { %v1707_v13 = vsel %vm908_vm2, %v1704_v18, %v1706_v46  ;;  %v1708_v32 = vsel %vm908_vm2, %v1706_v46, %v1704_v18 }
 0x386   : > { %v1709_v33 = vmul.f32 %v1708_v32, %v3597_v56  ;;  %v1710_v61 = vmul.f32 %v1707_v13, %v3600_v57  ;;  %v4009_v49 = vmul.f32 %v1707_v13, %v3638_v24  ;;  %v4012_v3 = vmul.f32 %v1708_v32, %v3671_v40 }
 0x387   : > { %v1712_v9 = vpop.permute.xlu0 %1711  ;;  %v4025_v24 = vsub.f32 %v3987_v17, %v4428_v22  ;;  %v1843_v40 = vand.u32 4294901760, %v4006_v16 }
 0x388   : > { %v1760_v4 = vand.u32 4294901760, %v1709_v33  ;;  %v1714_v10 = vpop.permute.xlu1 %1713  ;;  %v1758_v31 = vand.u32 4294901760, %v1710_v61  ;;  %v1782_v35 = vand.u32 4294901760, %v4012_v3 }
 0x389   : > { %v1715_v56 = vsel %vm925_vm3, %v1712_v9, %v1714_v10  ;;  %v1716_v57 = vsel %vm925_vm3, %v1714_v10, %v1712_v9  ;;  %v1904_v23 = vand.u32 4294901760, %v4025_v24  ;;  %v4054_v50 = vsub.f32 %v4006_v16, %v1843_v40  ;;  %v4480_v9 = vld [vmem:[#allocation13_spill] sm:$0xff] }
 0x38a   : > { %v4018_v48 = vsub.f32 %v1709_v33, %v1760_v4  ;;  %v1717_v30 = vmul.f32 %v1716_v57, %v3590_v52  ;;  %v1718_v5 = vmul.f32 %v1715_v56, %v3594_v54  ;;  %v4029_v58 = vmul.f32 %v1715_v56, %v3603_v60 }
 0x38b   : > { %v1720_v63 = vpop.permute.xlu0 %1719  ;;  %v4032_v8 = vmul.f32 %v1716_v57, %v4477_v53  ;;  %v1784_v52 = vand.u32 4294901760, %v4009_v49  ;;  %v4041_v6 = vsub.f32 %v1710_v61, %v1758_v31  ;;  %v4063_v14 = vsub.f32 %v4012_v3, %v1782_v35  ;;  %v4481_v53 = vld [vmem:[#allocation14_spill] sm:$0xff] }
 0x38c   : > { %v1722_v34 = vpop.permute.xlu1 %1721  ;;  %v1764_v54 = vand.u32 4294901760, %v1717_v30  ;;  %v1860_v25 = vand.u32 4294901760, %v4018_v48  ;;  %v1762_v38 = vand.u32 4294901760, %v1718_v5  ;;  %v1788_v44 = vand.u32 4294901760, %v4029_v58 }
 0x38d   : > { %v1723_v60 = vsel %vm942_vm4, %v1720_v63, %v1722_v34  ;;  %v1724_v28 = vsel %vm942_vm4, %v1722_v34, %v1720_v63  ;;  %v1786_v37 = vand.u32 4294901760, %v4032_v8  ;;  %v4068_v15 = vsub.f32 %v4009_v49, %v1784_v52 }
 0x38e   : > { %v4048_v62 = vsub.f32 %v1717_v30, %v1764_v54  ;;  %v1725_v21 = vmul.f32 %v1724_v28, %v4478_v43  ;;  %v1726_v1 = vmul.f32 %v1723_v60, %v4479_v41  ;;  %v1861_v18 = vsub.f32 %v4018_v48, %v1860_v25 }
 0x38f   : > { %v1728_v59 = vpop.permute.xlu0 %1727  ;;  %v1854_v13 = vand.u32 4294901760, %v4041_v6  ;;  %v4079_v32 = vpack.c.bf16 %v1764_v54, %v1760_v4  ;;  %v4081_v33 = vsub.f32 %v1718_v5, %v1762_v38  ;;  %v4085_v57 = vsub.f32 %v4032_v8, %v1786_v37  ;;  %v4482_v54 = vld [vmem:[#allocation17_spill] sm:$0xff] }
 0x390   : > { %v1730_v45 = vpop.permute.xlu1 %1729  ;;  %v1872_v26 = vand.u32 4294901760, %v4048_v62  ;;  %v1768_v11 = vand.u32 4294901760, %v1725_v21  ;;  %v1766_v61 = vand.u32 4294901760, %v1726_v1  ;;  %v4090_v30 = vsub.f32 %v4029_v58, %v1788_v44 }
 0x391   : > { %v1731_v20 = vsel %vm959_vm5, %v1728_v59, %v1730_v45  ;;  %v1732_v46 = vsel %vm959_vm5, %v1730_v45, %v1728_v59  ;;  %v1748_v59 = vmul.f32 %v4482_v54, %v1724_v28  ;;  %v4099_v41 = vpack.c.bf16 %v1762_v38, %v1758_v31  ;;  %v4484_v31 = vld [vmem:[#allocation15_spill] sm:$0xff] }
 0x392   : > { %v1733_v10 = vmul.f32 %v1732_v46, %v4480_v9  ;;  %v4092_v63 = vsub.f32 %v1725_v21, %v1768_v11  ;;  %v1734_v34 = vmul.f32 %v1731_v20, %v4481_v53  ;;  %v1873_v5 = vsub.f32 %v4048_v62, %v1872_v26  ;;  %v4483_v20 = vld [vmem:[#allocation18_spill] sm:$0xff] }
 0x393   : > { %v1736_v56 = vpop.permute.xlu0 %1735  ;;  %v4107_v9 = vmul.f32 %v4483_v20, %v1723_v60  ;;  %v4109_v53 = vsub.f32 %v1726_v1, %v1766_v61  ;;  %2886 = vmatprep.subr.bf16.mxu1 %v4099_v41  ;;  %v1845_v24 = vand.u32 4294901760, %v4054_v50 }
 0x394   : > { %v1738_v4 = vpop.permute.xlu1 %1737  ;;  %v1772_v43 = vand.u32 4294901760, %v1733_v10  ;;  %v4430_v8 = vand.u32 4294901760, %v4092_v63  ;;  %v1770_v45 = vand.u32 4294901760, %v1734_v34  ;;  %2888 = vmatpush1.bf16.msra.mxu1 %v4079_v32 }
 0x395   : > { %v1739_v46 = vsel %vm976_vm6, %v1736_v56, %v1738_v4  ;;  %v1740_v21 = vsel %vm976_vm6, %v1738_v4, %v1736_v56  ;;  %v1866_v4 = vand.u32 4294901760, %v4081_v33 }
 0x396   : > { %v4111_v36 = vsub.f32 %v1733_v10, %v1772_v43  ;;  %v1741_v28 = vmul.f32 %v1739_v46, %v4484_v31  ;;  %v4115_v38 = vpack.c.bf16 %v1772_v43, %v1768_v11  ;;  %v4117_v54 = vsub.f32 %v1734_v34, %v1770_v45 }
 0x397   : > { %v1742_v42 = vmul.f32 %v1740_v21, %v4485_v19  ;;  %v4121_v56 = vpack.c.bf16 %v1770_v45, %v1766_v61  ;;  %v1855_v10 = vsub.f32 %v4041_v6, %v1854_v13  ;;  %v4128_v46 = vand.u32 4294901760, %v1748_v59 }
 0x398   : > { %v4429_v60 = vand.u32 4294901760, %v4111_v36  ;;  %v1780_v1 = vand.u32 4294901760, %v1741_v28  ;;  %v1885_v11 = vsub.f32 %v4092_v63, %v4430_v8  ;;  %v1874_v19 = vand.u32 4294901760, %v1873_v5 }
 0x399   : > { %v1778_v34 = vand.u32 4294901760, %v1742_v42  ;;  %2890 = vmatprep.subr.bf16.mxu1 %v4121_v56  ;;  %v1862_v45 = vand.u32 4294901760, %v1861_v18  ;;  %v4141_v21 = vpack.c.bf16 %v1786_v37, %v1782_v35  ;;  %v1867_v5 = vsub.f32 %v4081_v33, %v1866_v4 }
 0x39a   : > { %v1897_v61 = vsub.f32 %v4111_v36, %v4429_v60  ;;  %v4137_v43 = vsub.f32 %v1741_v28, %v1780_v1  ;;  %v4145_v20 = vpack.c.bf16 %v1780_v1, %v1776_v12  ;;  %2892 = vmatpush1.bf16.msra.mxu1 %v4115_v38  ;;  %v1856_v35 = vand.u32 4294901760, %v1855_v10 }
 0x39b   : > { %v4147_v31 = vsub.f32 %v1742_v42, %v1778_v34  ;;  %v4155_v28 = vpack.c.bf16 %v1778_v34, %v1774_v7  ;;  %v4433_v37 = vand.u32 4294901760, %v4109_v53  ;;  %v4432_v47 = vand.u32 4294901760, %v4117_v54 }
 0x39c   : > { %v4427_v3 = vand.u32 4294901760, %v4137_v43  ;;  %v1868_v12 = vand.u32 4294901760, %v1867_v5  ;;  %v2903_v18 = vpack.c.bf16 %v1874_v19, %v1862_v45  ;;  %v1898_v42 = vand.u32 4294901760, %v1897_v61 }
 0x39d   : > { %2894 = vmatprep.subr.bf16.mxu1 %v4155_v28  ;;  %v4431_v1 = vand.u32 4294901760, %v4147_v31  ;;  %v1879_v7 = vsub.f32 %v4109_v53, %v4433_v37  ;;  %v1891_v10 = vsub.f32 %v4117_v54, %v4432_v47  ;;  %v1938_v34 = vand.u32 4294901760, %v4085_v57 }
 0x39e   : > { %v1921_v55 = vsub.f32 %v4137_v43, %v4427_v3  ;;  %v1944_v19 = vand.u32 4294901760, %v4090_v30  ;;  %v2901_v45 = vpack.c.bf16 %v1868_v12, %v1856_v35  ;;  %2896 = vmatpush1.bf16.msra.mxu1 %v4145_v20  ;;  %v1926_v5 = vand.u32 4294901760, %v4063_v14 }
 0x39f   : > { %v1915_v61 = vsub.f32 %v4147_v31, %v4431_v1  ;;  %v4179_v3 = vand.u32 4294901760, %v4107_v9  ;;  %2898 = vmatprep.subr.bf16.mxu1 %v4141_v21  ;;  %v1880_v22 = vand.u32 4294901760, %v1879_v7  ;;  %v1892_v60 = vand.u32 4294901760, %v1891_v10 }
 0x3a0   : > { %v1886_v8 = vand.u32 4294901760, %v1885_v11  ;;  %v4186_v35 = vpack.c.bf16 %v1788_v44, %v1784_v52  ;;  %v4189_v12 = vsub.f32 %v1748_v59, %v4128_v46  ;;  %2902 = vmatprep.subr.bf16.mxu0 %v2901_v45  ;;  %v1939_v47 = vsub.f32 %v4085_v57, %v1938_v34 }
 0x3a1   : > { %v1916_v1 = vand.u32 4294901760, %v1915_v61  ;;  %v1932_v37 = vand.u32 4294901760, %v4068_v15  ;;  %2904 = vmatpush1.bf16.msra.mxu0 %v2903_v18  ;;  %v2905_v7 = vpack.c.bf16 %v1892_v60, %v1880_v22  ;;  %v1922_v10 = vand.u32 4294901760, %v1921_v55 }
 0x3a2   : > { %v2907_v11 = vpack.c.bf16 %v1898_v42, %v1886_v8  ;;  %2900 = vmatpush1.bf16.msra.mxu1 %v4186_v35  ;;  %v1927_v58 = vsub.f32 %v4063_v14, %v1926_v5  ;;  %v1945_v52 = vsub.f32 %v4090_v30, %v1944_v19  ;;  %v4206_v44 = vsub.f32 %v4107_v9, %v4179_v3 }
 0x3a3   : > { %v2909_v49 = vpack.c.bf16 %v1916_v1, %v1904_v23  ;;  %2906 = vmatprep.subr.bf16.mxu0 %v2905_v7  ;;  %1791 = vmatprep.subr.mxu1 %v4128_v46  ;;  %v1910_v22 = vand.u32 4294901760, %v4039_v27  ;;  %v1940_v23 = vand.u32 4294901760, %v1939_v47  ;;  %v1950_v59 = vand.u32 4294901760, %v4189_v12 }
 0x3a4   : > { %v1933_v8 = vsub.f32 %v4068_v15, %v1932_v37  ;;  %v1928_v9 = vand.u32 4294901760, %v1927_v58  ;;  %v1956_v18 = vand.u32 4294901760, %v4206_v44  ;;  %v1946_v42 = vand.u32 4294901760, %v1945_v52 }
 0x3a5   : > { %2908 = vmatpush1.bf16.msra.mxu0 %v2907_v11  ;;  %v2911_v60 = vpack.c.bf16 %v1922_v10, %v1910_v22  ;;  %v1951_v50 = vsub.f32 %v4189_v12, %v1950_v59  ;;  %v2917_v7 = vpack.c.bf16 %v4081_v33, %v4041_v6  ;;  %v2919_v11 = vpack.c.bf16 %v4048_v62, %v4018_v48 }
 0x3a6   : > { %2910 = vmatprep.subr.bf16.mxu0 %v2909_v49  ;;  %1793 = vmatpush1.msra.mxu1 %v4179_v3  ;;  %v2913_v27 = vpack.c.bf16 %v1940_v23, %v1928_v9  ;;  %v1934_v47 = vand.u32 4294901760, %v1933_v8  ;;  %v1957_v55 = vsub.f32 %v4206_v44, %v1956_v18  ;;  %v2921_v10 = vpack.c.bf16 %v4117_v54, %v4109_v53 }
 0x3a7   : > { %1846 = vmatmul.mubr.f32.vlgmr.msra.gmra.mrb[6].mxu1 %v1845_v24  ;;  %v1952_v45 = vand.u32 4294901760, %v1951_v50  ;;  %v2923_v49 = vpack.c.bf16 %v4111_v36, %v4092_v63  ;;  %v2925_v58 = vpack.c.bf16 %v4147_v31, %v3987_v17  ;;  %v2927_v52 = vpack.c.bf16 %v4137_v43, %v3993_v0 }
 0x3a8   : > { %v2915_v1 = vpack.c.bf16 %v1946_v42, %v1934_v47  ;;  %v1958_v61 = vand.u32 4294901760, %v1957_v55  ;;  %v2929_v22 = vpack.c.bf16 %v4085_v57, %v4063_v14  ;;  %v2931_v24 = vpack.c.bf16 %v4090_v30, %v4068_v15  ;;  %v2500_v14 = vld [vmem:[%s4397_s2 + $0x8] sm:$0xff]  ;;  %v2501_v57 = vld [vmem:[%s4397_s2 + $0x10] sm:$0xff] }
 0x3a9   : > { %2912 = vmatpush1.bf16.msra.mxu0 %v2911_v60  ;;  %v3114_v60 = vld [vmem:[%s4399_s4] sm:$0xff]  ;;  %v2951_v50 = vpack.c.bf16 %v1872_v26, %v1860_v25  ;;  %v4486_v47 = vand.u32 4294901760, %v4109_v53  ;;  %v3236_v6 = vmov 5   ;;  %v4488_v48 = vand.u32 4294901760, %v4092_v63 }
 0x3aa   : > { %2914 = vmatprep.subr.bf16.mxu0 %v2913_v27  ;;  %v2949_v27 = vpack.c.bf16 %v1866_v4, %v1854_v13  ;;  %v4489_v62 = vand.u32 4294901760, %v4111_v36  ;;  %v279_v13 = vld [vmem:[%s4399_s4 + $0x8] sm:$0xff]  ;;  %v4492_v33 = vand.u32 4294901760, %v3993_v0  ;;  %v4493_v53 = vand.u32 4294901760, %v4137_v43 }
 0x3ab   : > { %v2961_v36 = vpack.c.bf16 %v1938_v34, %v1926_v5  ;;  %v2963_v0 = vpack.c.bf16 %v1944_v19, %v1932_v37  ;;  %v4494_v15 = vmov 0  }
 0x3ac   : > { %v2955_v25 = vpack.c.bf16 %v4489_v62, %v4488_v48  ;;  %v2959_v63 = vpack.c.bf16 %v4493_v53, %v4492_v33  ;;  %v4497_v53 = vld [vmem:[#allocation8_spill] sm:$0xff] }
 0x3ad   : > { %2916 = vmatpush1.bf16.msra.mxu0 %v2915_v1  ;;  %v4487_v1 = vand.u32 4294901760, %v4117_v54  ;;  %v281_v54 = vld [vmem:[%s4399_s4 + $0x18] sm:$0xff] }
 0x3ae   : > { %1953 = vmatprep.subr.mxu0 %v1952_v45 }
 0x3af   : > { %v2953_v55 = vpack.c.bf16 %v4487_v1, %v4486_v47 }
 0x3b1   : > { %1959 = vmatpush1.msra.mxu0 %v1958_v61 }
 0x3b2   : > { %2918 = vmatprep.subr.bf16.mxu0 %v2917_v7  ;;  %2008 = vmatmul.mubr.f32.vlgmr.msra.gmra.mrb[4].mxu0 %v4001_v2 }
 0x3b3   : > { %2920 = vmatpush1.bf16.msra.mxu0 %v2919_v11  ;;  %2114 = vmatprep.mubr.f32.mxu0 %v4459_v29 }
 0x3b4   : > { %2922 = vmatprep.subr.bf16.mxu0 %v2921_v10 }
 0x3b7   : > { %2924 = vmatpush1.bf16.msra.mxu0 %v2923_v49 }
 0x3b8   : > { %2926 = vmatprep.subr.bf16.mxu0 %v2925_v58 }
 0x3bb   : > { %2928 = vmatpush1.bf16.msra.mxu0 %v2927_v52 }
 0x3bc   : > { %2930 = vmatprep.subr.bf16.mxu0 %v2929_v22 }
 0x3bf   : > { %2932 = vmatpush1.bf16.msra.mxu0 %v2931_v24 }
 0x3c0   : > { %2064 = vmatprep.subr.mxu0 %v4189_v12 }
 0x3c3   : > { %2067 = vmatpush1.msra.mxu0 %v4206_v44 }
 0x3c4   : > { %2934 = vmatprep.subr.bf16.mxu0 %v4099_v41  ;;  %2117 = vmatmul.mubr.f32.vlgmr.msra.gmra.mrb[4].mxu0 %v4006_v16  ;;  %v4490_v16 = vand.u32 4294901760, %v3987_v17  ;;  %v280_v17 = vld [vmem:[%s4399_s4 + $0x10] sm:$0xff] }
 0x3c5   : > { %2936 = vmatpush1.bf16.msra.mxu0 %v4079_v32  ;;  %2205 = vmatprep.mubr.f32.mxu0 %v4459_v29 }
 0x3c6   : > { %2938 = vmatprep.subr.bf16.mxu0 %v4121_v56 }
 0x3c9   : > { %2940 = vmatpush1.bf16.msra.mxu0 %v4115_v38 }
 0x3ca   : > { %2942 = vmatprep.subr.bf16.mxu0 %v4155_v28 }
 0x3cd   : > { %v885_v23 = vpop.xlane.xlu0 %884  ;;  %2944 = vmatpush1.bf16.msra.mxu0 %v4145_v20 }
 0x3ce   : > { %v886_v8 = vmul.f32 0.00390625, %v885_v23  ;;  %2946 = vmatprep.subr.bf16.mxu0 %v4141_v21 }
 0x3d0   : > { %v887_v9 = vadd.f32 %v3114_v60, %v886_v8 }
 0x3d1   : > { %2948 = vmatpush1.bf16.msra.mxu0 %v4186_v35 }
 0x3d2   : > { %v888_v42 = vmax.f32 %v887_v9, 0.0  ;;  %2156 = vmatprep.subr.mxu0 %v4128_v46  ;;  %v4496_v9 = vld [vmem:[#allocation9_spill] sm:$0xff] }
 0x3d4   : > { %2459 = vperm.xlu1 %3093, %v888_v42  }
 0x3d5   : > { %2158 = vmatpush1.msra.mxu0 %v4179_v3  ;;  %v2506_v48 = vpop.permute.xlu0 %2505 }
 0x3d6   : > { %2950 = vmatprep.subr.bf16.mxu0 %v2949_v27  ;;  %2209 = vmatmul.mubr.f32.vlgmr.msra.gmra.mrb[4].mxu0 %v1843_v40  ;;  %v4491_v40 = vand.u32 4294901760, %v4147_v31 }
 0x3d7   : > { %2952 = vmatpush1.bf16.msra.mxu0 %v2951_v50  ;;  %2333 = vmatprep.mubr.f32.mxu0 %v4459_v29 }
 0x3d8   : > { %2954 = vmatprep.subr.bf16.mxu0 %v2953_v55  ;;  %3094 = vset.pattern.permute.xlu1 %v3236_v6  ;;  %v2957_v26 = vpack.c.bf16 %v4491_v40, %v4490_v16 }
 0x3d9   : > { %2473 = vperm.xlu1 %3094, %v3114_v60  }
 0x3db   : > { %2956 = vmatpush1.bf16.msra.mxu0 %v2955_v25 }
 0x3dc   : > { %2958 = vmatprep.subr.bf16.mxu0 %v2957_v26 }
 0x3dd   : > { %2478 = vperm.xlu1 %3094, %v279_v13  }
 0x3df   : > { %2960 = vmatpush1.bf16.msra.mxu0 %v2959_v63 }
 0x3e0   : > { %2962 = vmatprep.subr.bf16.mxu0 %v2961_v36 }
 0x3e1   : > { %2483 = vperm.xlu1 %3094, %v280_v17  }
 0x3e3   : > { %2964 = vmatpush1.bf16.msra.mxu0 %v2963_v0 }
 0x3e4   : > { %2282 = vmatprep.subr.mxu0 %v1950_v59 }
 0x3e5   : > { %2488 = vperm.xlu1 %3094, %v281_v54  }
 0x3e7   : > { %2286 = vmatpush1.msra.mxu0 %v1956_v18 }
 0x3e8   : > { %2966 = vmatprep.subr.bf16.mxu0 %v4099_v41  ;;  %2335 = vmatmul.mubr.f32.vlgmr.msra.gmra.mrb[4].mxu0 %v4001_v2  ;;  %v1753_v41 = vpop.permute.xlu1 %1752 }
 0x3e9   : > { %2968 = vmatpush1.bf16.msra.mxu0 %v4079_v32  ;;  %2423 = vmatprep.mubr.f32.mxu0 %v4459_v29  ;;  %v4495_v29 = vmov 1  }
 0x3ea   : > { %2970 = vmatprep.subr.bf16.mxu0 %v4121_v56  ;;  %3095 = vset.pattern.permute.xlu1 %v4494_v15 }
 0x3eb   : > { %2510 = vperm.xlu1 %3095, %v2500_v14  }
 0x3ed   : > { %2972 = vmatpush1.bf16.msra.mxu0 %v4115_v38  ;;  %v2435_v38 = vpop.permute.xlu1 %2434 }
 0x3ee   : > { %2974 = vmatprep.subr.bf16.mxu0 %v4155_v28 }
 0x3ef   : > { %2515 = vperm.xlu1 %3095, %v2501_v57  }
 0x3f1   : > { %2976 = vmatpush1.bf16.msra.mxu0 %v4145_v20  ;;  %v2453_v56 = vpop.permute.xlu1 %2452 }
 0x3f2   : > { %2978 = vmatprep.subr.bf16.mxu0 %v4141_v21 }
 0x3f3   : > { %2520 = vperm.xlu1 %3095, %v3976_v51  }
 0x3f5   : > { %2980 = vmatpush1.bf16.msra.mxu0 %v4186_v35 }
 0x3f6   : > { %2374 = vmatprep.subr.mxu0 %v4128_v46 }
 0x3f7   : > { %3096 = vset.pattern.permute.xlu1 %v4495_v29 }
 0x3f8   : > { %2548 = vperm.xlu1 %3096, %v3967_v39  }
 0x3f9   : > { %2376 = vmatpush1.msra.mxu0 %v4179_v3 }
 0x3fa   : > { %2425 = vmatmul.mubr.f32.vlgmr.msra.gmra.mrb[4].mxu0 %v4001_v2 }
 0x3fc   : > { %2552 = vperm.xlu1 %3096, %v2500_v14  }
 0x400   : > { %2556 = vperm.xlu1 %3096, %v2501_v57  }
 0x453   : > { %v2460_v51 = vpop.permute.xlu1 %2459 }
 0x458   : > { %v2474_v4 = vpop.permute.xlu1 %2473 }
 0x45c   : > { %v2479_v43 = vpop.permute.xlu1 %2478 }
 0x460   : > { %v2484_v21 = vpop.permute.xlu1 %2483 }
 0x464   : > { %v2489_v46 = vpop.permute.xlu1 %2488 }
 0x46a   : > { %v2511_v3 = vpop.permute.xlu1 %2510 }
 0x46e   : > { %v2516_v44 = vpop.permute.xlu1 %2515 }
 0x472   : > { %v2521_v10 = vpop.permute.xlu1 %2520 }
 0x477   : > { %v2549_v8 = vpop.permute.xlu1 %2548 }
 0x47a   : > { %v1847_v32 = vpop.f32.mrb[6].mxu1 }
 0x47b   : > { %v1849_v30 = vpop.f32.mrb[7].mxu1  ;;  %v1848_v20 = vadd.f32 %v1847_v32, %v1753_v41  ;;  %v2553_v26 = vpop.permute.xlu1 %2552 }
 0x47c   : > { %v1850_v31 = vadd.f32 %v1849_v30, %v1753_v41 }
 0x4cd   : > { %v2426_v28 = vpop.f32.mrb[4].mxu0 }
 0x4ce   : > { %v2988_v39 = vadd.f32 %v2426_v28, %v1848_v20  ;;  %v2428_v37 = vpop.f32.mrb[5].mxu0 }
 0x4cf   : > { %v2990_v34 = vadd.f32 %v2428_v37, %v1850_v31 }
 0x4d0   : > { %v2431_v2 = vmax.f32 %v2988_v39, 0.0 }
 0x4d1   : > { %v2432_v19 = vmax.f32 %v2990_v34, 0.0  ;;  %v2557_v34 = vpop.permute.xlu1 %2556 }
 0x4d2   : > { %v2437_v5 = vmul.f32 %v2435_v38, %v2431_v2 }
 0x4d3   : > { %v2438_v35 = vmul.f32 %v2435_v38, %v2432_v19 }
 0x4d4   : > { %v2439_v12 = vrot.slane %v2437_v5, 4 }
 0x4d5   : > { %v2445_v59 = vrot.slane %v2438_v35, 4 }
 0x4d6   : > { %v2440_v18 = vadd.f32 %v2439_v12, %v2437_v5 }
 0x4d7   : > { %v2446_v45 = vadd.f32 %v2445_v59, %v2438_v35 }
 0x4d8   : > { %v2441_v61 = vrot.slane %v2440_v18, 2 }
 0x4d9   : > { %v2447_v7 = vrot.slane %v2446_v45, 2 }
 0x4da   : > { %v2442_v11 = vadd.f32 %v2441_v61, %v2440_v18 }
 0x4db   : > { %v2448_v49 = vadd.f32 %v2447_v7, %v2446_v45 }
 0x4dc   : > { %v2443_v58 = vrot.slane %v2442_v11, 1 }
 0x4dd   : > { %v2449_v52 = vrot.slane %v2448_v49, 1 }
 0x4de   : > { %v2444_v22 = vadd.f32 %v2443_v58, %v2442_v11 }
 0x4df   : > { %v2450_v24 = vadd.f32 %v2449_v52, %v2448_v49 }
 0x4e0   : > { %v2455_v23 = vadd.f32 %v2453_v56, %v2444_v22 }
 0x4e1   : > { %v2456_v60 = vadd.f32 %v2453_v56, %v2450_v24 }
 0x4e2   : > { %v2465_v42 = vrot.slane %v2455_v23, %v4496_v9 }
 0x4e3   : > { %v2469_v27 = vrot.slane %v2456_v60, %v4496_v9 }
 0x4e4   : > { %v2470_v50 = vmul.f32 %v2465_v42, %v2460_v51  ;;  %v2493_v1 = vmul.f32 %v2479_v43, %v2465_v42  ;;  %v2495_v55 = vmul.f32 %v2484_v21, %v2465_v42  ;;  %v2497_v6 = vmul.f32 %v2489_v46, %v2465_v42 }
 0x4e5   : > { %v2471_v47 = vmul.f32 %v2469_v27, %v2460_v51  ;;  %v2494_v62 = vmul.f32 %v2479_v43, %v2469_v27  ;;  %v2496_v16 = vmul.f32 %v2484_v21, %v2469_v27  ;;  %v2491_v40 = vmul.f32 %v2474_v4, %v2465_v42  ;;  %v2561_v51 = vpop.permute.xlu0 %2560 }
 0x4e6   : > { %v2526_v25 = vrot.slane %v2470_v50, %v4496_v9  ;;  %v2492_v33 = vmul.f32 %v2474_v4, %v2469_v27  ;;  %v2566_v63 = vrot.slane %v2470_v50, %v4497_v53  ;;  %v2498_v38 = vmul.f32 %v2489_v46, %v2469_v27 }
 0x4e7   : > { %v2530_v13 = vrot.slane %v2471_v47, %v4496_v9  ;;  %v2570_v36 = vrot.slane %v2471_v47, %v4497_v53 }
 0x4e8   : > { %v2533_v17 = vmul.f32 %v2526_v25, %v2511_v3  ;;  %v2535_v0 = vmul.f32 %v2526_v25, %v2516_v44  ;;  %v2537_v54 = vmul.f32 %v2526_v25, %v2521_v10  ;;  %v2531_v14 = vmul.f32 %v2526_v25, %v2506_v48  ;;  %v3115_v25 = vld [vmem:[%s3385_s13] sm:$0xff] }
 0x4e9   : > { %v2534_v15 = vmul.f32 %v2530_v13, %v2511_v3  ;;  %v2536_v57 = vmul.f32 %v2530_v13, %v2516_v44  ;;  %v2538_v29 = vmul.f32 %v2530_v13, %v2521_v10  ;;  %v2532_v32 = vmul.f32 %v2530_v13, %v2506_v48 }
 0x4ea   : > { %v2541_v30 = vadd.f32 %v2533_v17, %v2493_v1  ;;  %v2543_v41 = vadd.f32 %v2535_v0, %v2495_v55  ;;  %v2539_v56 = vadd.f32 %v2531_v14, %v2491_v40  ;;  %v2545_v4 = vadd.f32 %v2537_v54, %v2497_v6  ;;  %v3117_v0 = vld [vmem:[%s3385_s13 + $0x10] sm:$0xff] }
 0x4eb   : > { %v2542_v43 = vadd.f32 %v2534_v15, %v2494_v62  ;;  %v2544_v21 = vadd.f32 %v2536_v57, %v2496_v16  ;;  %v2540_v20 = vadd.f32 %v2532_v32, %v2492_v33  ;;  %v2571_v31 = vmul.f32 %v2566_v63, %v2549_v8  ;;  %v3116_v33 = vld [vmem:[%s3385_s13 + $0x8] sm:$0xff]  ;;  %v3118_v57 = vld [vmem:[%s3385_s13 + $0x18] sm:$0xff] }
 0x4ec   : > { %v2572_v28 = vmul.f32 %v2570_v36, %v2549_v8  ;;  %v2573_v39 = vmul.f32 %v2566_v63, %v2553_v26  ;;  %v2574_v37 = vmul.f32 %v2570_v36, %v2553_v26  ;;  %v2546_v2 = vadd.f32 %v2538_v29, %v2498_v38 }
 0x4ed   : > { %v2575_v19 = vmul.f32 %v2566_v63, %v2557_v34  ;;  %v2576_v3 = vmul.f32 %v2570_v36, %v2557_v34  ;;  %v2577_v5 = vmul.f32 %v2566_v63, %v2561_v51  ;;  %v2579_v35 = vadd.f32 %v2571_v31, %v2539_v56  ;;  %v3122_v31 = vld [vmem:[%s3385_s13 + $0x38] sm:$0xff] }
 0x4ee   : > { %v2580_v12 = vadd.f32 %v2572_v28, %v2540_v20  ;;  %v2581_v44 = vadd.f32 %v2573_v39, %v2541_v30  ;;  %v2582_v59 = vadd.f32 %v2574_v37, %v2542_v43  ;;  %v2578_v45 = vmul.f32 %v2570_v36, %v2561_v51  ;;  %v3120_v51 = vld [vmem:[%s3385_s13 + $0x28] sm:$0xff] }
 0x4ef   : > { %v2583_v46 = vadd.f32 %v2575_v19, %v2543_v41  ;;  %v2584_v18 = vadd.f32 %v2576_v3, %v2544_v21  ;;  %v2587_v61 = vmul.f32 0.5, %v2579_v35  ;;  %v2585_v10 = vadd.f32 %v2577_v5, %v2545_v4  ;;  %v3119_v41 = vld [vmem:[%s3385_s13 + $0x20] sm:$0xff]  ;;  %v3121_v4 = vld [vmem:[%s3385_s13 + $0x30] sm:$0xff] }
 0x4f0   : > { %v2588_v7 = vmul.f32 0.5, %v2580_v12  ;;  %v2589_v11 = vmul.f32 0.5, %v2581_v44  ;;  %v2590_v49 = vmul.f32 0.5, %v2582_v59  ;;  %v2586_v58 = vadd.f32 %v2578_v45, %v2546_v2 }
 0x4f1   : > { %3098 = vtanh.f32 %v2587_v61  ;;  %v2591_v52 = vmul.f32 0.5, %v2583_v46  ;;  %v2592_v22 = vmul.f32 0.5, %v2584_v18  ;;  %v2593_v24 = vmul.f32 0.5, %v2585_v10 }
 0x4f2   : > { %3100 = vtanh.f32 %v2588_v7  ;;  %v2594_v23 = vmul.f32 0.5, %v2586_v58 }
 0x4f3   : > { %3102 = vtanh.f32 %v2589_v11 }
 0x4f4   : > { %3104 = vtanh.f32 %v2590_v49 }
 0x4f5   : > { %3106 = vtanh.f32 %v2591_v52 }
 0x4f6   : > { %3108 = vtanh.f32 %v2592_v22 }
 0x4f7   : > { %3110 = vtanh.f32 %v2593_v24 }
 0x4f8   : > { %3112 = vtanh.f32 %v2594_v23 }
 0x4fb   : > { %v3099_v8 = vpop.eup %3098 }
 0x4fc   : > { %v3101_v60 = vpop.eup %3100  ;;  %v2603_v9 = vmul.f32 0.5, %v3099_v8 }
 0x4fd   : > { %v3103_v42 = vpop.eup %3102  ;;  %v2604_v27 = vmul.f32 0.5, %v3101_v60 }
 0x4fe   : > { %v3105_v50 = vpop.eup %3104  ;;  %v2611_v47 = vadd.f32 1.5, %v2603_v9  ;;  %v2605_v1 = vmul.f32 0.5, %v3103_v42 }
 0x4ff   : > { %v3107_v55 = vpop.eup %3106  ;;  %v2612_v6 = vadd.f32 1.5, %v2604_v27  ;;  %v2606_v48 = vmul.f32 0.5, %v3105_v50 }
 0x500   : > { %v3109_v62 = vpop.eup %3108  ;;  %v2619_v16 = vmul.f32 %v3115_v25, %v2611_v47  ;;  %v2613_v40 = vadd.f32 1.5, %v2605_v1  ;;  %v2607_v26 = vmul.f32 0.5, %v3107_v55 }
 0x501   : > { %v3111_v13 = vpop.eup %3110  ;;  %v2620_v53 = vmul.f32 %v3116_v33, %v2612_v6  ;;  %v2614_v63 = vadd.f32 1.5, %v2606_v48  ;;  %v2608_v36 = vmul.f32 0.5, %v3109_v62 }
 0x502   : > { %v3113_v17 = vpop.eup %3112  ;;  %2627 = vst [vmem:[%s269_s19] sm:$0xff] %v2619_v16  ;;  %v2621_v54 = vmul.f32 %v3117_v0, %v2613_v40  ;;  %v2615_v14 = vadd.f32 1.5, %v2607_v26  ;;  %v2609_v15 = vmul.f32 0.5, %v3111_v13 }
 0x503   : > { %2628 = vst [vmem:[%s269_s19 + $0x8] sm:$0xff] %v2620_v53  ;;  %v2622_v29 = vmul.f32 %v3118_v57, %v2614_v63  ;;  %v2616_v32 = vadd.f32 1.5, %v2608_v36  ;;  %v2610_v30 = vmul.f32 0.5, %v3113_v17 }
 0x504   : > { %2629 = vst [vmem:[%s269_s19 + $0x10] sm:$0xff] %v2621_v54  ;;  %v2623_v38 = vmul.f32 %v3119_v41, %v2615_v14  ;;  %v2617_v56 = vadd.f32 1.5, %v2609_v15 }
 0x505   : > { %2630 = vst [vmem:[%s269_s19 + $0x18] sm:$0xff] %v2622_v29  ;;  %v2624_v43 = vmul.f32 %v3120_v51, %v2616_v32  ;;  %v2618_v21 = vadd.f32 1.5, %v2610_v30 }
 0x506   : > { %2631 = vst [vmem:[%s269_s19 + $0x20] sm:$0xff] %v2623_v38  ;;  %v2625_v20 = vmul.f32 %v3121_v4, %v2617_v56 }
 0x507   : > { %2632 = vst [vmem:[%s269_s19 + $0x28] sm:$0xff] %v2624_v43  ;;  %v2626_v28 = vmul.f32 %v3122_v31, %v2618_v21 }
 0x508   : > { %2633 = vst [vmem:[%s269_s19 + $0x30] sm:$0xff] %v2625_v20 }
 0x509   : > { %2634 = vst [vmem:[%s269_s19 + $0x38] sm:$0xff] %v2626_v28 }
 0x50a   : > { %3166 = shalt.err (!%p3163_p2)
}
 0x50b   : > { %s3167_s13 = scalar_lea.hbm %s4348_s8, 1024  ;;  %s3171_s18 = scalar_lea.hbm %s4401_s6, 2048 }
 0x50c   : > { %p3168_p4 = scmp.ne.s32.totalorder %s4348_s8, %s3167_s13  ;;  %p3172_p9 = scmp.lt.u32.totalorder %s4348_s8, %s4401_s6 }
 0x50d   : > { %p3173_p1 = scmp.lt.u32.totalorder %s3171_s18, %s3167_s13  ;;  %p3175_p6 = scmp.lt.u32.totalorder %s3167_s13, %s4348_s8 }
 0x50e   : > { %p3169_p5 = pnand %p3168_p4, %p4498_p11 }
 0x50f   : > { %p3174_p3 = por %p3173_p1, %p3172_p9 }
 0x510   : > { %p3170_p7 = pneg %p3169_p5 }
 0x511   : > { %p3176_p12 = por %p3175_p6, %p3174_p3 }
 0x513   : > { %p3177_p13 = pnand %p3176_p12, %p3170_p7 }
 0x515   : > { %3180 = shalt.err (!%p3177_p13)
}
 0x516   : > { %s3238_s7 = smov 256   ;;  %s3239_s12 = smov 16  }
 0x517   : > { %3027 = dma.vmem_to_hbm [thread:$0]  (%p4498_p11), %s4350_s11, 1024, %s4348_s8, %s2636_s25, %s3238_s7, %s3238_s7, %s3239_s12  }
 0x518 PF: > { %s2664_s16 = sand.u32 1, %s3207_s21   ;;  %p4499_p8 = scmp.ne.s32.totalorder %s4437_s10, 0 }
 0x519   : > { %p4500_p10 = scmp.ge.s32.totalorder %s3219_s24, 2  ;;  %s2665_s14 = scalar_lea.sflag [#allocation4], %s2664_s16 }
 0x51b   : > { %p3034_p0 = pnand %p4500_p10, %p4499_p8 }
 0x51d   : > { %3202 = dma.done.wait (!%p3034_p0), %s2665_s14, 1024  }
 0x51e   : > { %3204 = vsyncadd (!%p3034_p0), %s2665_s14, 4294966272  ;;  %p19_p2 = scmp.ge.s32.totalorder %s3300_s27, 4   ;;  %s4501_s21 = smov %s3211_s22 }
 0x51f   : > { %s4502_s22 = smov %s3215_s23  ;;  %s4503_s23 = smov %s3312_s30 }
 0x520   : > { %s4504_s24 = smov %s3300_s27  ;;  %21 = sbr.rel (!%p19_p2) target bundleno = 5 (0x5), region = 90 }
 0x527   :  { %2670 = vsyncpa [#allocation3], 1 }
 0x528   :  { %2672 = vsyncpa [#allocation3 + $0x1], 1 }
 0x529   :  { %2673 = vsyncpa [#allocation4], 1 }
 0x52a   :  { %2675 = vsyncpa [#allocation4 + $0x1], 1 }

</bundles_post_ra>
